<compile_context>
chip_gen: v6e
topology: v6e:2x2x1
jax: 0.10.0
libtpu: 0.0.40
codegen_flags: <defaults>
</compile_context>

<pallas_src>
import jax
import jax.numpy as jnp
from jax import lax
from jax.experimental import pallas as pl
from jax.experimental.pallas import tpu as pltpu


def _round_up(a, b):
    return ((a + b - 1) // b) * b


# ----------------------------------------------------------------------------
# Pallas kernel: fused (phi|gate) matmul + BN-bias + ReLU + Sigmoid + gating
# ----------------------------------------------------------------------------
def _gated_conv_kernel(p_ref, w_ref, bias_ref, o_ref):
    # One MXU matmul for both branches: columns [0, C) hold the BN-scale-folded
    # phi weights, columns [C, 2C) hold the gate weights.
    fused = jnp.dot(p_ref[...], w_ref[...],
                    preferred_element_type=jnp.float32)        # (tm, 2*Cout_pad)
    c = bias_ref.shape[-1]                                     # Cout_pad (static)

    # phi branch: conv*inv_std (folded into weights) + bias -> ReLU
    phi = jnp.maximum(fused[:, :c] + bias_ref[...], 0.0)

    # gate branch: sigmoid via EUP exp + approximate reciprocal (idle slots)
    gate = pl.reciprocal(1.0 + jnp.exp(-fused[:, c:]), approx=True)

    o_ref[...] = (phi * gate).astype(o_ref.dtype)


# ----------------------------------------------------------------------------
# Glue: im2col for 3-D convolution (plain JAX, pure indexing / reshapes)
# ----------------------------------------------------------------------------
def _im2col_3d(x, ksize, stride, dilation, padding):
    N, C, D, H, W = x.shape
    kd, kh, kw = ksize
    xp = jnp.pad(
        x, ((0, 0), (0, 0), (padding,) * 2, (padding,) * 2, (padding,) * 2))
    Do = (D + 2 * padding - dilation * (kd - 1) - 1) // stride + 1
    Ho = (H + 2 * padding - dilation * (kh - 1) - 1) // stride + 1
    Wo = (W + 2 * padding - dilation * (kw - 1) - 1) // stride + 1

    cols = []
    for i in range(kd):
        for j in range(kh):
            for k in range(kw):
                sl = xp[:, :,
                        i * dilation: i * dilation + stride * Do: stride,
                        j * dilation: j * dilation + stride * Ho: stride,
                        k * dilation: k * dilation + stride * Wo: stride]
                cols.append(sl)
    # (N, C, kd*kh*kw, Do, Ho, Wo)  -- channel-major then kernel offsets,
    # matching PyTorch weight.reshape(Cout, Cin*kd*kh*kw)
    cols = jnp.stack(cols, axis=2)
    cols = cols.reshape(N, C * kd * kh * kw, Do, Ho, Wo)
    cols = jnp.transpose(cols, (0, 2, 3, 4, 1))
    cols = cols.reshape(N * Do * Ho * Wo, C * kd * kh * kw)
    return cols, (Do, Ho, Wo)


# ----------------------------------------------------------------------------
# Wrapper
# ----------------------------------------------------------------------------
def gated_convolution(x, params, *, stride=1, dilation=1, padding=0,
                      tm=512, compute_dtype=jnp.bfloat16):
    w_phi = params["w_phi"]          # (Cout, Cin, kd, kh, kw)
    w_gate = params["w_gate"]        # (Cout, Cin, kd, kh, kw)
    gamma, beta = params["bn_gamma"], params["bn_beta"]
    rmean, rvar = params["bn_mean"], params["bn_var"]
    eps = 1e-5

    Cout = w_phi.shape[0]
    kd, kh, kw = w_phi.shape[2:]

    patches, (Do, Ho, Wo) = _im2col_3d(
        x, (kd, kh, kw), stride, dilation, padding)
    M, Ck = patches.shape

    # Alignment padding: contraction / output channel dims -> multiples of 128
    # (lane-dense loads & stores, tile-aligned phi/gate split); rows -> tm.
    Ck_pad = _round_up(Ck, 128)
    Cout_pad = _round_up(Cout, 128)
    tm = max(8, min(tm, _round_up(M, 8)))
    M_pad = _round_up(M, tm)

    patches = jnp.pad(patches, ((0, M_pad - M), (0, Ck_pad - Ck)))
    patches = patches.astype(compute_dtype)

    # BatchNorm (inference) folded: scale into the phi weights, bias separate.
    inv_std = gamma / jnp.sqrt(rvar + eps)
    wphi_m = w_phi.reshape(Cout, Ck).T * inv_std[None, :]        # (Ck, Cout)
    wgate_m = w_gate.reshape(Cout, Ck).T                         # (Ck, Cout)
    wphi_m = jnp.pad(wphi_m, ((0, Ck_pad - Ck), (0, Cout_pad - Cout)))
    wgate_m = jnp.pad(wgate_m, ((0, Ck_pad - Ck), (0, Cout_pad - Cout)))
    w_fused = jnp.concatenate([wphi_m, wgate_m], axis=1).astype(compute_dtype)

    bias = jnp.pad(beta - rmean * inv_std, (0, Cout_pad - Cout))
    bias = bias.reshape(1, Cout_pad).astype(jnp.float32)

    cdt_isz = jnp.dtype(compute_dtype).itemsize
    out_isz = jnp.dtype(x.dtype).itemsize

    # VMEM budget: double-buffered patch/output tiles + resident weights/bias
    # + f32 fused intermediate, with headroom.  Capped for v7x (64 MiB / TC).
    block_bytes = (2 * tm * Ck_pad * cdt_isz                 # patches (2 bufs)
                   + 2 * Ck_pad * 2 * Cout_pad * cdt_isz     # fused weights
                   + 2 * tm * Cout_pad * out_isz             # output (2 bufs)
                   + tm * 2 * Cout_pad * 4                   # f32 intermediate
                   + 2 * Cout_pad * 4)                       # bias
    vmem_limit = int(min(max(2 * block_bytes, 16 * 1024 * 1024),
                         48 * 1024 * 1024))

    cost = pl.CostEstimate(
        flops=2 * M_pad * Ck_pad * 2 * Cout_pad,
        transcendentals=M_pad * Cout_pad,
        bytes_accessed=(M_pad * Ck_pad * cdt_isz
                        + Ck_pad * 2 * Cout_pad * cdt_isz
                        + Cout_pad * 4
                        + M_pad * Cout_pad * out_isz))

    out = pl.pallas_call(
        _gated_conv_kernel,
        out_shape=jax.ShapeDtypeStruct((M_pad, Cout_pad), x.dtype),
        grid_spec=pltpu.PrefetchScalarGridSpec(
            num_scalar_prefetch=0,
            grid=(M_pad // tm,),
            in_specs=[
                pl.BlockSpec((tm, Ck_pad), lambda i: (i, 0)),        # patches
                pl.BlockSpec((Ck_pad, 2 * Cout_pad), lambda i: (0, 0)),  # W
                pl.BlockSpec((1, Cout_pad), lambda i: (0, 0)),       # BN bias
            ],
            out_specs=pl.BlockSpec((tm, Cout_pad), lambda i: (i, 0)),
        ),
        compiler_params=pltpu.CompilerParams(
            dimension_semantics=("parallel",),
            vmem_limit_bytes=vmem_limit),
        cost_estimate=cost,
    )(patches, w_fused, bias)

    # NOTE: keep this slice -- padded rows/columns carry garbage / zeros.
    out = out[:M, :Cout].reshape(x.shape[0], Do, Ho, Wo, Cout)
    return jnp.transpose(out, (0, 4, 1, 2, 3))    # back to NCDHW


# ----------------------------------------------------------------------------
# Pure-JAX reference (for correctness check)
# ----------------------------------------------------------------------------
def gated_convolution_reference(x, params, *, stride=1, dilation=1, padding=0):
    eps = 1e-5
    dn = lax.conv_dimension_numbers(
        x.shape, params["w_phi"].shape, ("NCDHW", "OIDHW", "NCDHW"))

    def conv(w):
        return lax.conv_general_dilated(
            x, w, (stride,) * 3, [(padding, padding)] * 3,
            rhs_dilation=(dilation,) * 3, dimension_numbers=dn)

    inv_std = params["bn_gamma"] / jnp.sqrt(params["bn_var"] + eps)
    scale = inv_std[None, :, None, None, None]
    bias = (params["bn_beta"] - params["bn_mean"] * inv_std)[
        None, :, None, None, None]
    phi = jnp.maximum(conv(params["w_phi"]) * scale + bias, 0.0)
    gate = jax.nn.sigmoid(conv(params["w_gate"]))
    return phi * gate


# ----------------------------------------------------------------------------
if __name__ == "__main__":
    key = jax.random.PRNGKey(0)
    k_x, k_wp, k_wg, k_g, k_b, k_m, k_v = jax.random.split(key, 7)

    N, Cin, Cout = 2, 4, 8
    D = H = W = 8
    ksz, stride, dilation, padding = 3, 1, 1, 1
    fan_in = Cin * ksz * ksz * ksz

    x = jax.random.normal(k_x, (N, Cin, D, H, W), dtype=jnp.float32)
    params = {
        "w_phi": jax.random.normal(
            k_wp, (Cout, Cin, ksz, ksz, ksz), jnp.float32) / jnp.sqrt(fan_in),
        "w_gate": jax.random.normal(
            k_wg, (Cout, Cin, ksz, ksz, ksz), jnp.float32) / jnp.sqrt(fan_in),
        "bn_gamma": 1.0 + 0.1 * jax.random.normal(k_g, (Cout,), jnp.float32),
        "bn_beta": 0.1 * jax.random.normal(k_b, (Cout,), jnp.float32),
        "bn_mean": 0.1 * jax.random.normal(k_m, (Cout,), jnp.float32),
        "bn_var": 1.0 + 0.1 * jnp.abs(
            jax.random.normal(k_v, (Cout,), jnp.float32)),
    }

    out = gated_convolution(
        x, params, stride=stride, dilation=dilation, padding=padding)
    out = jax.block_until_ready(out)

    ref = gated_convolution_reference(
        x, params, stride=stride, dilation=dilation, padding=padding)
    ref = jax.block_until_ready(ref)

    assert out.shape == (N, Cout, D, H, W), out.shape
    # bf16 matmul inputs (f32 accumulation) -> slightly looser tolerance.
    max_err = float(jnp.max(jnp.abs(out - ref)))
    assert jnp.allclose(out, ref, rtol=3e-2, atol=3e-2), max_err

    print("KERNEL_OK")
</pallas_src>

<mosaic_0001>
module attributes {stable_mosaic.version = 11 : i64} {
  func.func @_gated_conv_kernel(%arg0: i32, %arg1: memref<512x128xbf16, #tpu.memory_space<vmem>>, %arg2: memref<128x256xbf16, #tpu.memory_space<vmem>>, %arg3: memref<1x128xf32, #tpu.memory_space<vmem>>, %arg4: memref<512x128xf32, #tpu.memory_space<vmem>>) attributes {dimension_semantics = [#tpu.dimension_semantics<parallel>], iteration_bounds = array<i64: 2>, scalar_prefetch = 0 : i64, scratch_operands = 0 : i64, tpu.core_type = #tpu.core_type<tc>, window_params = [{transform_indices = @transform_0, window_bounds = array<i64: 512, 128>}, {pipeline_mode = #tpu.pipeline_mode<synchronous>, transform_indices = @transform_1, window_bounds = array<i64: 128, 256>}, {pipeline_mode = #tpu.pipeline_mode<synchronous>, transform_indices = @transform_2, window_bounds = array<i64: 1, 128>}, {transform_indices = @transform_3, window_bounds = array<i64: 512, 128>}]} {
    %c0 = arith.constant 0 : index
    %c0_0 = arith.constant 0 : index
    %0 = vector.load %arg1[%c0, %c0_0] : memref<512x128xbf16, #tpu.memory_space<vmem>>, vector<512x128xbf16>
    %c0_1 = arith.constant 0 : index
    %c0_2 = arith.constant 0 : index
    %1 = vector.load %arg2[%c0_1, %c0_2] : memref<128x256xbf16, #tpu.memory_space<vmem>>, vector<128x256xbf16>
    %cst = arith.constant dense<0.000000e+00> : vector<512x256xf32>
    %2 = tpu.matmul %0, %1, %cst {dimension_numbers = #tpu.dot_dimension_numbers<[1], [0], [0], [1], [0, 0, 1, 1], [], []>} : vector<512x128xbf16>, vector<128x256xbf16>, vector<512x256xf32> -> vector<512x256xf32>
    %3 = vector.extract_strided_slice %2 {offsets = [0, 0], sizes = [512, 128], strides = [1, 1]} : vector<512x256xf32> to vector<512x128xf32>
    %c0_3 = arith.constant 0 : index
    %c0_4 = arith.constant 0 : index
    %4 = vector.load %arg3[%c0_3, %c0_4] : memref<1x128xf32, #tpu.memory_space<vmem>>, vector<1x128xf32>
    %5 = vector.broadcast %4 : vector<1x128xf32> to vector<512x128xf32>
    %6 = arith.addf %3, %5 : vector<512x128xf32>
    %cst_5 = arith.constant 0.000000e+00 : f32
    %7 = vector.broadcast %cst_5 : f32 to vector<512x128xf32>
    %8 = arith.maximumf %6, %7 : vector<512x128xf32>
    %9 = vector.extract_strided_slice %2 {offsets = [0, 128], sizes = [512, 128], strides = [1, 1]} : vector<512x256xf32> to vector<512x128xf32>
    %cst_6 = arith.constant 0.000000e+00 : f32
    %10 = vector.broadcast %cst_6 : f32 to vector<512x128xf32>
    %11 = arith.subf %10, %9 : vector<512x128xf32>
    %12 = math.exp %11 : vector<512x128xf32>
    %cst_7 = arith.constant 1.000000e+00 : f32
    %13 = vector.broadcast %cst_7 : f32 to vector<512x128xf32>
    %14 = arith.addf %13, %12 : vector<512x128xf32>
    %15 = tpu.reciprocal %14 {approx = true} : vector<512x128xf32> -> vector<512x128xf32>
    %16 = arith.mulf %8, %15 : vector<512x128xf32>
    %c0_8 = arith.constant 0 : index
    %c0_9 = arith.constant 0 : index
    %17 = vector.load %arg4[%c0_8, %c0_9] : memref<512x128xf32, #tpu.memory_space<vmem>>, vector<512x128xf32>
    tpu.vector_store %arg4[%c0_8, %c0_9], %16 {strides = array<i32>} : memref<512x128xf32, #tpu.memory_space<vmem>>, vector<512x128xf32>,
    return
  }
  func.func @transform_0(%arg0: i32) -> (i32, i32) {
    %c0_i32 = arith.constant 0 : i32
    %c0_i32_0 = arith.constant 0 : i32
    return %arg0, %c0_i32 : i32, i32
  }
  func.func @transform_1(%arg0: i32) -> (i32, i32) {
    %c0_i32 = arith.constant 0 : i32
    %c0_i32_0 = arith.constant 0 : i32
    %c0_i32_1 = arith.constant 0 : i32
    return %c0_i32, %c0_i32_0 : i32, i32
  }
  func.func @transform_2(%arg0: i32) -> (i32, i32) {
    %c0_i32 = arith.constant 0 : i32
    %c0_i32_0 = arith.constant 0 : i32
    %c0_i32_1 = arith.constant 0 : i32
    return %c0_i32, %c0_i32_0 : i32, i32
  }
  func.func @transform_3(%arg0: i32) -> (i32, i32) {
    %c0_i32 = arith.constant 0 : i32
    %c0_i32_0 = arith.constant 0 : i32
    return %arg0, %c0_i32 : i32, i32
  }
}

</mosaic_0001>

<bundles_post_ra>
// kernel: tpu_custom_call.1
= control target key start
LH: loop header
LB: loop body
LE: loop exit
PB: predicated region body
PF: predicated region fallthrough
CT: control target
= control target key end

     0   :  { %8 = vsyncpa [#allocation3], 0  ;;  %s2791_s0 = inlined_call_operand.hbm [shape: bf16[1024,128], index: 0, kind: input, shape index: {}]   ;;  %s2792_s1 = inlined_call_operand.hbm [shape: bf16[128,256], index: 1, kind: input, shape index: {}]   ;;  %s2793_s2 = inlined_call_operand.vmem [shape: f32[1,128], index: 2, kind: input, shape index: {}]   ;;  %s2794_s3 = inlined_call_operand.hbm [shape: f32[1024,128], index: 3, kind: output, shape index: {}]  }
   0x1   :  { %10 = vsyncpa [#allocation3 + $0x1], 0 }
   0x2   :  { %11 = vsyncpa [#allocation6], 0 }
   0x3   :  { %12 = vsyncpa [#allocation4], 0 }
   0x4   :  { %14 = vsyncpa [#allocation4 + $0x1], 0  ;;  %s2206_s12 = smov 0   ;;  %s2208_s13 = smov 0  }
   0x5   :  { %s2210_s14 = smov 0   ;;  %s2212_s15 = smov 0  }
   0x6 LB: > { %s2227_s16 = sadd.s32 4294967295, %s2174_s15   ;;  %s1592_s17 = sadd.s32 4294967294, %s2174_s15   ;;  %s2174_s15 = sphi %s2212_s15, %s2816_s15   ;;  %s2170_s14 = sphi %s2210_s14, %s2815_s14   ;;  %s2166_s13 = sphi %s2208_s13, %s2814_s13   ;;  %s2162_s12 = sphi %s2206_s12, %s2813_s12  }
   0x7   : > { %p40_p0 = scmp.ne.s32.totalorder %s2166_s13, %s2162_s12  ;;  %p2795_p1 = scmp.eq.s32.totalorder %s2227_s16, 0 }
   0x8   : > { %p112_p3 = scmp.eq.s32.totalorder %s1592_s17, 1  ;;  %p1593_p5 = scmp.ge.s32.totalorder %s2174_s15, 1 }
   0x9   : > { %p2236_p4 = por %p2795_p1, %p40_p0  ;;  %p119_p7 = scmp.lt.s32.totalorder %s2174_s15, 3 }
   0xa   : > { %p2241_p6 = por %p112_p3, %p40_p0  ;;  %s2176_s21 = smov [#allocation5]  }
   0xb   : > { %s2799_s18 = scalar_select %p2236_p4, 1, 0 }
   0xc   : > { %s2800_s19 = scalar_select %p2241_p6, 1, 0 }
   0xd   : > { %p2246_p8 = pnand %p1593_p5, %p119_p7  ;;  %s131_s22 = sshll.u32 %s2176_s21, 4  ;;  %s132_s22 = int_to_ptr.vmem [resolvable:$true] %s131_s22 }
   0xe   : > { %s2260_s24 = sadd.s32 1, %s2174_s15   ;;  %s27_s25 = sadd.s32 1, %s2170_s14 }
   0xf   : > { %s2801_s20 = scalar_select %p2246_p8, 1, 0 }
  0x10   : > { %p1683_p9 = pneg %p2246_p8  ;;  %s24_s26 = ssub.s32 %s2174_s15, %s2260_s24 }
  0x11   : > { %s2063_s27 = scalar_lea.vmem %s132_s22, 2048  ;;  %p2071_p5 = scmp.lt.s32.totalorder %s132_s22, %s132_s22 }
  0x12   : > { %p2255_p11 = pnand %p1683_p9, %p2795_p1  ;;  %p2064_p13 = scmp.ne.s32.totalorder %s132_s22, %s2063_s27 }
  0x13   : > { %p2072_p7 = scmp.lt.s32.totalorder %s2063_s27, %s2063_s27 }
  0x14   : > { %p2054_p12 = pneg %p2255_p11 }
  0x15   : > { %p2073_p10 = por %p2072_p7, %p2071_p5 }
  0x16   : > { %p2066_p0 = pnand %p2064_p13, %p2054_p12 }
  0x18   : > { %p2067_p3 = pneg %p2066_p0 }
  0x1a   : > { %p2074_p2 = pnand %p2073_p10, %p2067_p3 }
  0x1c   : > { %2077 = shalt.err (!%p2074_p2)
}
  0x1d   : > { %s2177_s28 = smov 128   ;;  %s2178_s29 = smov 8  }
  0x1e   : > { %1686 = dma.hbm_to_vmem [thread:$0]  (!%p2255_p11), %s2792_s1, 2048, %s132_s22, [#allocation6], %s2177_s28, %s2177_s28, %s2178_s29  }
  0x1f   : > { %p25_p9 = scmp.eq.s32.totalorder %s24_s26, 0  ;;  %p34_p12 = scmp.ne.s32.totalorder %s2170_s14, %s2166_s13 }
  0x20   : > { %p35_p10 = scmp.eq.s32.totalorder %s2174_s15, 0  ;;  %p1696_p2 = scmp.lt.s32.totalorder %s2174_s15, 2 }
  0x21   : > { %s2277_s5 = scalar_select %p25_p9, %s2170_s14, %s27_s25  }
  0x22   : > { %p36_p13 = por %p35_p10, %p34_p12  ;;  %p2803_p0 = scmp.eq.s32.totalorder %s2227_s16, 1 }
  0x23   : > { %s148_s7 = sand.u32 1, %s2170_s14   ;;  %s1657_s8 = sshll.u32 %s2174_s15, 12 }
  0x24   : > { %p2281_p3 = por %p2803_p0, %p34_p12  ;;  %s1596_s9 = sshll.u32 %s148_s7, 8 }
  0x25   : > { %s2290_s17 = scalar_lea.hbm %s2791_s0, %s1657_s8  ;;  %s152_s21 = scalar_lea.vmem [#allocation2], %s1596_s9 }
  0x26   : > { %s2804_s6 = scalar_select %p2281_p3, 1, 0 }
  0x27   : > { %s159_s22 = sshll.u32 %s152_s21, 4  ;;  %p2292_p11 = pnand %p1696_p2, %p36_p13  ;;  %s2296_s22 = int_to_ptr.vmem [resolvable:$true] %s159_s22 }
  0x28   : > { %s2298_s25 = scalar_lea.sflag [#allocation3], %s148_s7  ;;  %s2078_s26 = scalar_lea.hbm %s2290_s17, 4096 }
  0x29   : > { %p2079_p5 = scmp.ne.s32.totalorder %s2290_s17, %s2078_s26  ;;  %p2080_p7 = pneg %p2292_p11 }
  0x2a   : > { %s2083_s29 = scalar_lea.hbm %s2791_s0, 8192  ;;  %p2084_p10 = scmp.lt.s32.totalorder %s2290_s17, %s2791_s0 }
  0x2b   : > { %p2081_p9 = pnand %p2080_p7, %p2079_p5  ;;  %p2085_p2 = scmp.lt.s32.totalorder %s2083_s29, %s2078_s26 }
  0x2d   : > { %p2082_p12 = pneg %p2081_p9  ;;  %p2086_p13 = por %p2085_p2, %p2084_p10 }
  0x2f   : > { %p2087_p0 = pnand %p2086_p13, %p2082_p12 }
  0x31   : > { %2090 = shalt.err (!%p2087_p0)
}
  0x32   : > { %s2091_s7 = scalar_lea.vmem %s2296_s22, 4096  ;;  %s2179_s8 = smov [#allocation2]  }
  0x33   : > { %p2092_p1 = scmp.ne.s32.totalorder %s2296_s22, %s2091_s7  ;;  %s2096_s9 = sshll.u32 %s2179_s8, 4  ;;  %s2097_s9 = int_to_ptr.vmem [resolvable:$false] %s2096_s9 }
  0x34   : > { %s2098_s10 = scalar_lea.vmem %s2097_s9, 8192  ;;  %p2099_p9 = scmp.lt.s32.totalorder %s2296_s22, %s2097_s9 }
  0x35   : > { %p2094_p6 = pnand %p2092_p1, %p2080_p7  ;;  %p2100_p3 = scmp.lt.s32.totalorder %s2098_s10, %s2091_s7 }
  0x37   : > { %p2095_p5 = pneg %p2094_p6  ;;  %p2101_p4 = por %p2100_p3, %p2099_p9 }
  0x39   : > { %p2102_p8 = pnand %p2101_p4, %p2095_p5 }
  0x3b   : > { %2105 = shalt.err (!%p2102_p8)
}
  0x3c   : > { %s2180_s11 = smov 64   ;;  %s2181_s21 = smov 4  }
  0x3d   : > { %1690 = dma.hbm_to_vmem [thread:$0]  (!%p2292_p11), %s2290_s17, 4096, %s2296_s22, %s2298_s25, %s2180_s11, %s2180_s11, %s2181_s21  }
  0x3e   : > { %p2806_p1 = scmp.ne.s32.totalorder %s2801_s20, 0 }
  0x3f   : > { %s2322_s26 = sand.u32 (!%p2806_p1), 1, %s2166_s13   ;;  %p2807_p4 = scmp.ne.s32.totalorder (!%p2806_p1), %s2799_s18, 0 }
  0x40   : > { %171 = sbr.rel (%p2806_p1) target bundleno = 479 (0x1df), region = 32  ;;  %s1600_s27 = sshll.u32 (!%p2806_p1), %s2322_s26, 8 }
  0x41   : > { %s174_s28 = scalar_lea.sflag (!%p2806_p1), [#allocation3], %s2322_s26  ;;  %s2326_s29 = scalar_lea.vmem (!%p2806_p1), [#allocation2], %s1600_s27 }
  0x45   : > { %2149 = dma.done.wait (%p2807_p4), %s174_s28, 4096  }
  0x46   : > { %2151 = vsyncadd (%p2807_p4), %s174_s28, 4294963200  ;;  %p2808_p6 = scmp.eq.s32.totalorder %s2227_s16, 0 }
  0x48   : > { %2153 = dma.done.wait (%p2808_p6), [#allocation6], 2048   ;;  %p2809_p8 = pmov %p2808_p6 }
  0x49   : > { %v2182_v0 = vmov 0   ;;  %v1739_v1 = vld [vmem:[#allocation5 + $0x74] ss:$8 sps:$4 sm:$0xff]   ;;  %v1741_v2 = vld [vmem:[#allocation5 + $0x70] ss:$8 sps:$4 sm:$0xff]   ;;  %v1763_v17 = vld [vmem:[%s2326_s29] sm:$0xff]  }
  0x4a   : > { %2155 = vsyncadd (%p2809_p8), [#allocation6], 4294965248  ;;  %591 = vmatprep.mubr.bf16.mxu0 %v2182_v0  ;;  %751 = vmatprep.mubr.bf16.mxu1 %v2182_v0  ;;  %v1742_v3 = vld [vmem:[#allocation5 + $0x64] ss:$8 sps:$4 sm:$0xff]   ;;  %v1744_v4 = vld [vmem:[#allocation5 + $0x60] ss:$8 sps:$4 sm:$0xff]  }
  0x4b   : > { %559 = vmatprep.subr.bf16.mxu0 %v1739_v1  ;;  %1659 = vmatprep.subr.bf16.mxu1 %v1739_v1  ;;  %v1745_v5 = vld [vmem:[#allocation5 + $0x54] ss:$8 sps:$4 sm:$0xff]   ;;  %v1747_v6 = vld [vmem:[#allocation5 + $0x50] ss:$8 sps:$4 sm:$0xff]   ;;  %v1748_v7 = vld [vmem:[#allocation5 + $0x44] ss:$8 sps:$4 sm:$0xff]  }
  0x4c   : > { %560 = vmatpush1.bf16.msra.mxu0 %v1741_v2  ;;  %1667 = vmatpush1.bf16.msra.mxu1 %v1741_v2  ;;  %v1750_v8 = vld [vmem:[#allocation5 + $0x40] ss:$8 sps:$4 sm:$0xff]   ;;  %v1751_v9 = vld [vmem:[#allocation5 + $0x34] ss:$8 sps:$4 sm:$0xff]   ;;  %v1753_v10 = vld [vmem:[#allocation5 + $0x30] ss:$8 sps:$4 sm:$0xff]  }
  0x4d   : > { %561 = vmatprep.subr.bf16.mxu0 %v1742_v3  ;;  %1660 = vmatprep.subr.bf16.mxu1 %v1742_v3  ;;  %v1754_v11 = vld [vmem:[#allocation5 + $0x24] ss:$8 sps:$4 sm:$0xff]   ;;  %v1756_v12 = vld [vmem:[#allocation5 + $0x20] ss:$8 sps:$4 sm:$0xff]   ;;  %v1757_v13 = vld [vmem:[#allocation5 + $0x14] ss:$8 sps:$4 sm:$0xff]  }
  0x4e   : > { %v1759_v14 = vld [vmem:[#allocation5 + $0x10] ss:$8 sps:$4 sm:$0xff]   ;;  %v1760_v15 = vld [vmem:[#allocation5 + $0x4] ss:$8 sps:$4 sm:$0xff]   ;;  %v1762_v16 = vld [vmem:[#allocation5] ss:$8 sps:$4 sm:$0xff]  }
  0x4f   : > { %v1764_v18 = vld [vmem:[%s2326_s29 + $0x80] sm:$0xff]   ;;  %v1765_v19 = vld [vmem:[%s2326_s29 + $0x8] sm:$0xff]   ;;  %v1767_v21 = vld [vmem:[%s2326_s29 + $0x10] sm:$0xff]   ;;  %s1602_s17 = sshll.u32 %s2322_s26, 9  ;;  %s1658_s30 = sshll.u32 %s2227_s16, 13 }
  0x50   : > { %562 = vmatpush1.bf16.msra.mxu0 %v1744_v4  ;;  %1668 = vmatpush1.bf16.msra.mxu1 %v1744_v4  ;;  %v1766_v20 = vld [vmem:[%s2326_s29 + $0x88] sm:$0xff]   ;;  %v1768_v22 = vld [vmem:[%s2326_s29 + $0x90] sm:$0xff]   ;;  %v1769_v23 = vld [vmem:[%s2326_s29 + $0x18] sm:$0xff]   ;;  %s2458_s22 = scalar_lea.vmem [#allocation7], %s1602_s17  ;;  %s2744_s9 = scalar_lea.hbm %s2794_s3, %s1658_s30 }
  0x51   : > { %563 = vmatprep.subr.bf16.mxu0 %v1745_v5  ;;  %1661 = vmatprep.subr.bf16.mxu1 %v1745_v5  ;;  %v1770_v24 = vld [vmem:[%s2326_s29 + $0x98] sm:$0xff]   ;;  %v1771_v25 = vld [vmem:[%s2326_s29 + $0x20] sm:$0xff]   ;;  %v1773_v27 = vld [vmem:[%s2326_s29 + $0x28] sm:$0xff]   ;;  %s1509_s4 = sshll.u32 %s2458_s22, 4  ;;  %s1496_s16 = scalar_lea.sflag [#allocation4], %s2322_s26  ;;  %s2746_s4 = int_to_ptr.vmem [resolvable:$true] %s1509_s4 }
  0x52   : > { %v1772_v26 = vld [vmem:[%s2326_s29 + $0xa0] sm:$0xff]   ;;  %v1774_v28 = vld [vmem:[%s2326_s29 + $0xa8] sm:$0xff]   ;;  %v1775_v29 = vld [vmem:[%s2326_s29 + $0x30] sm:$0xff]   ;;  %s2106_s10 = scalar_lea.vmem %s2746_s4, 8192  ;;  %p2810_p11 = scmp.ne.s32.totalorder %s2804_s6, 0 }
  0x53   : > { %v1776_v30 = vld [vmem:[%s2326_s29 + $0xb0] sm:$0xff]   ;;  %v1777_v31 = vld [vmem:[%s2326_s29 + $0x38] sm:$0xff]   ;;  %v1779_v33 = vld [vmem:[%s2326_s29 + $0x40] sm:$0xff]   ;;  %p2107_p3 = scmp.ne.s32.totalorder %s2746_s4, %s2106_s10  ;;  %s2183_s11 = smov [#allocation7]  }
  0x54   : > { %564 = vmatpush1.bf16.msra.mxu0 %v1747_v6  ;;  %1669 = vmatpush1.bf16.msra.mxu1 %v1747_v6  ;;  %v1778_v32 = vld [vmem:[%s2326_s29 + $0xb8] sm:$0xff]   ;;  %v1780_v34 = vld [vmem:[%s2326_s29 + $0xc0] sm:$0xff]   ;;  %v1781_v35 = vld [vmem:[%s2326_s29 + $0x48] sm:$0xff]   ;;  %s2110_s21 = sshll.u32 %s2183_s11, 4  ;;  %s2111_s21 = int_to_ptr.vmem [resolvable:$false] %s2110_s21 }
  0x55   : > { %565 = vmatprep.subr.bf16.mxu0 %v1748_v7  ;;  %1662 = vmatprep.subr.bf16.mxu1 %v1748_v7  ;;  %v1782_v36 = vld [vmem:[%s2326_s29 + $0xc8] sm:$0xff]   ;;  %v1783_v37 = vld [vmem:[%s2326_s29 + $0x50] sm:$0xff]   ;;  %v1785_v39 = vld [vmem:[%s2326_s29 + $0x58] sm:$0xff]   ;;  %p2108_p7 = pnand %p2107_p3, %p2810_p11  ;;  %s2112_s27 = scalar_lea.vmem %s2111_s21, 16384 }
  0x56   : > { %v1784_v38 = vld [vmem:[%s2326_s29 + $0xd0] sm:$0xff]   ;;  %v1786_v40 = vld [vmem:[%s2326_s29 + $0xd8] sm:$0xff]   ;;  %v1787_v41 = vld [vmem:[%s2326_s29 + $0x60] sm:$0xff]   ;;  %p2113_p10 = scmp.lt.s32.totalorder %s2746_s4, %s2111_s21  ;;  %p2114_p2 = scmp.lt.s32.totalorder %s2112_s27, %s2106_s10 }
  0x57   : > { %v1788_v42 = vld [vmem:[%s2326_s29 + $0xe0] sm:$0xff]   ;;  %v1789_v43 = vld [vmem:[%s2326_s29 + $0x68] sm:$0xff]   ;;  %v1791_v45 = vld [vmem:[%s2326_s29 + $0x70] sm:$0xff]   ;;  %p2109_p12 = pneg %p2108_p7 }
  0x58   : > { %566 = vmatpush1.bf16.msra.mxu0 %v1750_v8  ;;  %1670 = vmatpush1.bf16.msra.mxu1 %v1750_v8  ;;  %v1790_v44 = vld [vmem:[%s2326_s29 + $0xe8] sm:$0xff]   ;;  %v1792_v46 = vld [vmem:[%s2326_s29 + $0xf0] sm:$0xff]   ;;  %v1793_v47 = vld [vmem:[%s2326_s29 + $0x78] sm:$0xff]   ;;  %p2115_p13 = por %p2114_p2, %p2113_p10 }
  0x59   : > { %567 = vmatprep.subr.bf16.mxu0 %v1751_v9  ;;  %1663 = vmatprep.subr.bf16.mxu1 %v1751_v9  ;;  %v1794_v48 = vld [vmem:[%s2326_s29 + $0xf8] sm:$0xff]  }
  0x5a   : > { %p2116_p0 = pnand %p2115_p13, %p2109_p12 }
  0x5c   : > { %568 = vmatpush1.bf16.msra.mxu0 %v1753_v10  ;;  %1671 = vmatpush1.bf16.msra.mxu1 %v1753_v10 }
  0x5d   : > { %569 = vmatprep.subr.bf16.mxu0 %v1754_v11  ;;  %1664 = vmatprep.subr.bf16.mxu1 %v1754_v11 }
  0x60   : > { %570 = vmatpush1.bf16.msra.mxu0 %v1756_v12  ;;  %1672 = vmatpush1.bf16.msra.mxu1 %v1756_v12 }
  0x61   : > { %571 = vmatprep.subr.bf16.mxu0 %v1757_v13  ;;  %1665 = vmatprep.subr.bf16.mxu1 %v1757_v13 }
  0x64   : > { %572 = vmatpush1.bf16.msra.mxu0 %v1759_v14  ;;  %1673 = vmatpush1.bf16.msra.mxu1 %v1759_v14 }
  0x65   : > { %573 = vmatprep.subr.bf16.mxu0 %v1760_v15  ;;  %1666 = vmatprep.subr.bf16.mxu1 %v1760_v15 }
  0x68   : > { %574 = vmatpush1.bf16.msra.mxu0 %v1762_v16  ;;  %1674 = vmatpush1.bf16.msra.mxu1 %v1762_v16 }
  0x6b   : > { %592 = vmatmul.mubr.bf16.vlgmr.msra.gmra.mxu0 %v1763_v17  ;;  %752 = vmatmul.mubr.bf16.vlgmr.msra.gmra.mxu1 %v1764_v18 }
  0x6c   : > { %601 = vmatprep.mubr.bf16.mxu0 %v2182_v0  ;;  %761 = vmatprep.mubr.bf16.mxu1 %v2182_v0 }
  0x73   : > { %602 = vmatmul.mubr.bf16.gmra.mxu0 %v1765_v19  ;;  %762 = vmatmul.mubr.bf16.gmra.mxu1 %v1766_v20 }
  0x74   : > { %611 = vmatprep.mubr.bf16.mxu0 %v2182_v0  ;;  %771 = vmatprep.mubr.bf16.mxu1 %v2182_v0 }
  0x7b   : > { %612 = vmatmul.mubr.bf16.gmra.mxu0 %v1767_v21  ;;  %772 = vmatmul.mubr.bf16.gmra.mxu1 %v1768_v22 }
  0x7c   : > { %621 = vmatprep.mubr.bf16.mxu0 %v2182_v0  ;;  %781 = vmatprep.mubr.bf16.mxu1 %v2182_v0 }
  0x83   : > { %622 = vmatmul.mubr.bf16.gmra.mxu0 %v1769_v23  ;;  %782 = vmatmul.mubr.bf16.gmra.mxu1 %v1770_v24 }
  0x84   : > { %631 = vmatprep.mubr.bf16.mxu0 %v2182_v0  ;;  %791 = vmatprep.mubr.bf16.mxu1 %v2182_v0 }
  0x8b   : > { %632 = vmatmul.mubr.bf16.gmra.mxu0 %v1771_v25  ;;  %792 = vmatmul.mubr.bf16.gmra.mxu1 %v1772_v26 }
  0x8c   : > { %641 = vmatprep.mubr.bf16.mxu0 %v2182_v0  ;;  %801 = vmatprep.mubr.bf16.mxu1 %v2182_v0 }
  0x93   : > { %642 = vmatmul.mubr.bf16.gmra.mxu0 %v1773_v27  ;;  %802 = vmatmul.mubr.bf16.gmra.mxu1 %v1774_v28 }
  0x94   : > { %651 = vmatprep.mubr.bf16.mxu0 %v2182_v0  ;;  %811 = vmatprep.mubr.bf16.mxu1 %v2182_v0 }
  0x9b   : > { %652 = vmatmul.mubr.bf16.gmra.mxu0 %v1775_v29  ;;  %812 = vmatmul.mubr.bf16.gmra.mxu1 %v1776_v30 }
  0x9c   : > { %661 = vmatprep.mubr.bf16.mxu0 %v2182_v0  ;;  %821 = vmatprep.mubr.bf16.mxu1 %v2182_v0 }
  0xa3   : > { %662 = vmatmul.mubr.bf16.gmra.mxu0 %v1777_v31  ;;  %822 = vmatmul.mubr.bf16.gmra.mxu1 %v1778_v32 }
  0xa4   : > { %671 = vmatprep.mubr.bf16.mxu0 %v2182_v0  ;;  %831 = vmatprep.mubr.bf16.mxu1 %v2182_v0 }
  0xab   : > { %672 = vmatmul.mubr.bf16.gmra.mxu0 %v1779_v33  ;;  %832 = vmatmul.mubr.bf16.gmra.mxu1 %v1780_v34 }
  0xac   : > { %681 = vmatprep.mubr.bf16.mxu0 %v2182_v0  ;;  %841 = vmatprep.mubr.bf16.mxu1 %v2182_v0 }
  0xb3   : > { %682 = vmatmul.mubr.bf16.gmra.mxu0 %v1781_v35  ;;  %842 = vmatmul.mubr.bf16.gmra.mxu1 %v1782_v36 }
  0xb4   : > { %691 = vmatprep.mubr.bf16.mxu0 %v2182_v0  ;;  %851 = vmatprep.mubr.bf16.mxu1 %v2182_v0 }
  0xbb   : > { %692 = vmatmul.mubr.bf16.gmra.mxu0 %v1783_v37  ;;  %852 = vmatmul.mubr.bf16.gmra.mxu1 %v1784_v38 }
  0xbc   : > { %701 = vmatprep.mubr.bf16.mxu0 %v2182_v0  ;;  %861 = vmatprep.mubr.bf16.mxu1 %v2182_v0 }
  0xc3   : > { %702 = vmatmul.mubr.bf16.gmra.mxu0 %v1785_v39  ;;  %862 = vmatmul.mubr.bf16.gmra.mxu1 %v1786_v40 }
  0xc4   : > { %711 = vmatprep.mubr.bf16.mxu0 %v2182_v0  ;;  %871 = vmatprep.mubr.bf16.mxu1 %v2182_v0 }
  0xcb   : > { %712 = vmatmul.mubr.bf16.gmra.mxu0 %v1787_v41  ;;  %872 = vmatmul.mubr.bf16.gmra.mxu1 %v1788_v42 }
  0xcc   : > { %721 = vmatprep.mubr.bf16.mxu0 %v2182_v0  ;;  %881 = vmatprep.mubr.bf16.mxu1 %v2182_v0 }
  0xd3   : > { %722 = vmatmul.mubr.bf16.gmra.mxu0 %v1789_v43  ;;  %882 = vmatmul.mubr.bf16.gmra.mxu1 %v1790_v44 }
  0xd4   : > { %731 = vmatprep.mubr.bf16.mxu0 %v2182_v0  ;;  %891 = vmatprep.mubr.bf16.mxu1 %v2182_v0 }
  0xdb   : > { %732 = vmatmul.mubr.bf16.gmra.mxu0 %v1791_v45  ;;  %892 = vmatmul.mubr.bf16.gmra.mxu1 %v1792_v46 }
  0xdc   : > { %741 = vmatprep.mubr.bf16.mxu0 %v2182_v0  ;;  %901 = vmatprep.mubr.bf16.mxu1 %v2182_v0 }
  0xe3   : > { %742 = vmatmul.mubr.bf16.gmra.mxu0 %v1793_v47  ;;  %902 = vmatmul.mubr.bf16.gmra.mxu1 %v1794_v48  ;;  %v2431_v48 = vld [vmem:[%s2793_s2] ss:$0 sm:$0xff] }
 0x12b   : > { %v2400_v49 = vpop.f32.mrf.mxu0  ;;  %v2402_v50 = vpop.f32.mrf.mxu1 }
 0x12d   : > { %v595_v51 = vpop.f32.mrf.mxu0  ;;  %v755_v52 = vpop.f32.mrf.mxu1 }
 0x12e   : > { %v1047_v53 = vsub.f32 0.0, %v595_v51  ;;  %v1079_v54 = vsub.f32 0.0, %v755_v52 }
 0x12f   : > { %v2404_v55 = vpop.f32.mrf.mxu0  ;;  %v2406_v56 = vpop.f32.mrf.mxu1 }
 0x130   : > { %v1111_v57 = vmul.f32 1.442695, %v1047_v53  ;;  %v1175_v58 = vmul.f32 1.442695, %v1079_v54 }
 0x131   : > { %v599_v59 = vpop.f32.mrf.mxu0  ;;  %v759_v60 = vpop.f32.mrf.mxu1 }
 0x132   : > { %1795 = vpow2.f32 %v1111_v57  ;;  %v1048_v61 = vsub.f32 0.0, %v599_v59  ;;  %v1080_v62 = vsub.f32 0.0, %v759_v60 }
 0x133   : > { %1797 = vpow2.f32 %v1175_v58  ;;  %v2408_v63 = vpop.f32.mrf.mxu0  ;;  %v2410_v0 = vpop.f32.mrf.mxu1 }
 0x134   : > { %v1113_v1 = vmul.f32 1.442695, %v1048_v61  ;;  %v1177_v2 = vmul.f32 1.442695, %v1080_v62  ;;  %v919_v62 = vadd.f32 %v2431_v48, %v2400_v49  ;;  %v920_v49 = vadd.f32 %v2431_v48, %v2404_v55 }
 0x135   : > { %v605_v3 = vpop.f32.mrf.mxu0  ;;  %v765_v4 = vpop.f32.mrf.mxu1 }
 0x136   : > { %1799 = vpow2.f32 %v1113_v1  ;;  %v1049_v5 = vsub.f32 0.0, %v605_v3  ;;  %v1081_v6 = vsub.f32 0.0, %v765_v4  ;;  %v951_v4 = vadd.f32 %v2431_v48, %v2402_v50 }
 0x137   : > { %1801 = vpow2.f32 %v1177_v2  ;;  %v2412_v7 = vpop.f32.mrf.mxu0  ;;  %v2414_v8 = vpop.f32.mrf.mxu1 }
 0x138   : > { %v1115_v9 = vmul.f32 1.442695, %v1049_v5  ;;  %v1179_v10 = vmul.f32 1.442695, %v1081_v6 }
 0x139   : > { %v609_v11 = vpop.f32.mrf.mxu0  ;;  %v769_v12 = vpop.f32.mrf.mxu1 }
 0x13a   : > { %1803 = vpow2.f32 %v1115_v9  ;;  %v1050_v13 = vsub.f32 0.0, %v609_v11  ;;  %v1082_v14 = vsub.f32 0.0, %v769_v12 }
 0x13b   : > { %1805 = vpow2.f32 %v1179_v10  ;;  %v2416_v15 = vpop.f32.mrf.mxu0  ;;  %v2418_v16 = vpop.f32.mrf.mxu1 }
 0x13c   : > { %v1117_v17 = vmul.f32 1.442695, %v1050_v13  ;;  %v1181_v18 = vmul.f32 1.442695, %v1082_v14 }
 0x13d   : > { %v615_v19 = vpop.f32.mrf.mxu0  ;;  %v775_v20 = vpop.f32.mrf.mxu1 }
 0x13e   : > { %1807 = vpow2.f32 %v1117_v17  ;;  %v1051_v21 = vsub.f32 0.0, %v615_v19  ;;  %v1083_v23 = vsub.f32 0.0, %v775_v20 }
 0x13f   : > { %v1796_v22 = vpop.eup %1795  ;;  %1809 = vpow2.f32 %v1181_v18  ;;  %v2420_v24 = vpop.f32.mrf.mxu0  ;;  %v983_v18 = vmax.f32 %v919_v62, 0.0 }
 0x140   : > { %v2422_v25 = vpop.f32.mrf.mxu1  ;;  %v1798_v26 = vpop.eup %1797  ;;  %v1239_v27 = vadd.f32 1.0, %v1796_v22  ;;  %v1119_v28 = vmul.f32 1.442695, %v1051_v21  ;;  %v1183_v30 = vmul.f32 1.442695, %v1083_v23  ;;  %v1015_v21 = vmax.f32 %v951_v4, 0.0 }
 0x141   : > { %v1271_v29 = vadd.f32 1.0, %v1798_v26  ;;  %v619_v31 = vpop.f32.mrf.mxu0  ;;  %v952_v22 = vadd.f32 %v2431_v48, %v2406_v56 }
 0x142   : > { %v779_v32 = vpop.f32.mrf.mxu1  ;;  %1811 = vrcp.f32 %v1239_v27  ;;  %v1052_v33 = vsub.f32 0.0, %v619_v31 }
 0x143   : > { %v1800_v34 = vpop.eup %1799  ;;  %1813 = vrcp.f32 %v1271_v29  ;;  %v1084_v35 = vsub.f32 0.0, %v779_v32  ;;  %v2424_v36 = vpop.f32.mrf.mxu0  ;;  %v984_v32 = vmax.f32 %v920_v49, 0.0 }
 0x144   : > { %v2426_v37 = vpop.f32.mrf.mxu1  ;;  %v1802_v38 = vpop.eup %1801  ;;  %v1240_v39 = vadd.f32 1.0, %v1800_v34  ;;  %1815 = vpow2.f32 %v1119_v28  ;;  %v1121_v40 = vmul.f32 1.442695, %v1052_v33  ;;  %v921_v33 = vadd.f32 %v2431_v48, %v2408_v63 }
 0x145   : > { %v1272_v41 = vadd.f32 1.0, %v1802_v38  ;;  %1817 = vpow2.f32 %v1183_v30  ;;  %v1185_v42 = vmul.f32 1.442695, %v1084_v35  ;;  %v625_v43 = vpop.f32.mrf.mxu0  ;;  %v953_v63 = vadd.f32 %v2431_v48, %v2410_v0 }
 0x146   : > { %v785_v44 = vpop.f32.mrf.mxu1  ;;  %1819 = vrcp.f32 %v1240_v39  ;;  %v1053_v45 = vsub.f32 0.0, %v625_v43 }
 0x147   : > { %v1085_v46 = vsub.f32 0.0, %v785_v44  ;;  %v1804_v47 = vpop.eup %1803  ;;  %1821 = vrcp.f32 %v1272_v41  ;;  %v2433_v51 = vpop.f32.mrf.mxu0 }
 0x148   : > { %v2435_v52 = vpop.f32.mrf.mxu1  ;;  %v1806_v53 = vpop.eup %1805  ;;  %v1241_v54 = vadd.f32 1.0, %v1804_v47  ;;  %1823 = vpow2.f32 %v1121_v40  ;;  %v1123_v57 = vmul.f32 1.442695, %v1053_v45 }
 0x149   : > { %v1273_v58 = vadd.f32 1.0, %v1806_v53  ;;  %1825 = vpow2.f32 %v1185_v42  ;;  %v1187_v59 = vmul.f32 1.442695, %v1085_v46  ;;  %v629_v60 = vpop.f32.mrf.mxu0  ;;  %v1016_v42 = vmax.f32 %v952_v22, 0.0 }
 0x14a   : > { %v789_v61 = vpop.f32.mrf.mxu1  ;;  %1827 = vrcp.f32 %v1241_v54  ;;  %v1054_v1 = vsub.f32 0.0, %v629_v60  ;;  %v922_v60 = vadd.f32 %v2431_v48, %v2412_v7 }
 0x14b   : > { %v1086_v2 = vsub.f32 0.0, %v789_v61  ;;  %v1808_v3 = vpop.eup %1807  ;;  %1829 = vrcp.f32 %v1273_v58  ;;  %v2441_v5 = vpop.f32.mrf.mxu0 }
 0x14c   : > { %v2443_v6 = vpop.f32.mrf.mxu1  ;;  %v1810_v9 = vpop.eup %1809  ;;  %v1242_v10 = vadd.f32 1.0, %v1808_v3  ;;  %1831 = vpow2.f32 %v1123_v57  ;;  %v1125_v11 = vmul.f32 1.442695, %v1054_v1 }
 0x14d   : > { %v1274_v12 = vadd.f32 1.0, %v1810_v9  ;;  %1833 = vpow2.f32 %v1187_v59  ;;  %v1189_v13 = vmul.f32 1.442695, %v1086_v2  ;;  %v635_v14 = vpop.f32.mrf.mxu0  ;;  %v985_v59 = vmax.f32 %v921_v33, 0.0 }
 0x14e   : > { %v795_v17 = vpop.f32.mrf.mxu1  ;;  %1835 = vrcp.f32 %v1242_v10  ;;  %v1055_v50 = vsub.f32 0.0, %v635_v14  ;;  %v1017_v9 = vmax.f32 %v953_v63, 0.0  ;;  %v954_v10 = vadd.f32 %v2431_v48, %v2414_v8 }
 0x14f   : > { %v1087_v19 = vsub.f32 0.0, %v795_v17  ;;  %v1812_v20 = vpop.eup %1811  ;;  %1837 = vrcp.f32 %v1274_v12  ;;  %v2450_v23 = vpop.f32.mrf.mxu0 }
 0x150   : > { %v2452_v26 = vpop.f32.mrf.mxu1  ;;  %v1814_v55 = vpop.eup %1813  ;;  %v1367_v27 = vmul.f32 %v1812_v20, %v983_v18  ;;  %1839 = vpow2.f32 %v1125_v11  ;;  %v1127_v28 = vmul.f32 1.442695, %v1055_v50  ;;  %v923_v20 = vadd.f32 %v2431_v48, %v2416_v15 }
 0x151   : > { %v1191_v29 = vmul.f32 1.442695, %v1087_v19  ;;  %v1816_v30 = vpop.eup %1815  ;;  %v1399_v31 = vmul.f32 %v1814_v55, %v1015_v21  ;;  %1841 = vpow2.f32 %v1189_v13  ;;  %v639_v34 = vpop.f32.mrf.mxu0  ;;  %v986_v19 = vmax.f32 %v922_v60, 0.0 }
 0x152   : > { %v799_v56 = vpop.f32.mrf.mxu1  ;;  %v1818_v35 = vpop.eup %1817  ;;  %1431 = vst [vmem:[%s2458_s22] sm:$0xff] %v1367_v27  ;;  %v1243_v38 = vadd.f32 1.0, %v1816_v30  ;;  %1843 = vpow2.f32 %v1127_v28  ;;  %v1056_v39 = vsub.f32 0.0, %v639_v34  ;;  %v1018_v30 = vmax.f32 %v954_v10, 0.0 }
 0x153   : > { %v1088_v40 = vsub.f32 0.0, %v799_v56  ;;  %v1820_v41 = vpop.eup %1819  ;;  %1463 = vst [vmem:[%s2458_s22 + $0x100] sm:$0xff] %v1399_v31  ;;  %v1275_v43 = vadd.f32 1.0, %v1818_v35  ;;  %1845 = vpow2.f32 %v1191_v29  ;;  %v2464_v44 = vpop.f32.mrf.mxu0  ;;  %v955_v31 = vadd.f32 %v2431_v48, %v2418_v16 }
 0x154   : > { %v2466_v45 = vpop.f32.mrf.mxu1  ;;  %v1822_v46 = vpop.eup %1821  ;;  %v1368_v47 = vmul.f32 %v1820_v41, %v984_v32  ;;  %1847 = vrcp.f32 %v1243_v38  ;;  %v1129_v53 = vmul.f32 1.442695, %v1056_v39  ;;  %v987_v41 = vmax.f32 %v923_v20, 0.0 }
 0x155   : > { %v1193_v54 = vmul.f32 1.442695, %v1088_v40  ;;  %v1824_v57 = vpop.eup %1823  ;;  %v1400_v58 = vmul.f32 %v1822_v46, %v1016_v42  ;;  %1849 = vrcp.f32 %v1275_v43  ;;  %v645_v0 = vpop.f32.mrf.mxu0  ;;  %v924_v42 = vadd.f32 %v2431_v48, %v2420_v24 }
 0x156   : > { %v805_v61 = vpop.f32.mrf.mxu1  ;;  %v1826_v62 = vpop.eup %1825  ;;  %1432 = vst [vmem:[%s2458_s22 + $0x8] sm:$0xff] %v1368_v47  ;;  %v1244_v1 = vadd.f32 1.0, %v1824_v57  ;;  %1851 = vpow2.f32 %v1129_v53  ;;  %v1057_v2 = vsub.f32 0.0, %v645_v0  ;;  %v1019_v57 = vmax.f32 %v955_v31, 0.0 }
 0x157   : > { %v1089_v3 = vsub.f32 0.0, %v805_v61  ;;  %v1828_v4 = vpop.eup %1827  ;;  %1464 = vst [vmem:[%s2458_s22 + $0x108] sm:$0xff] %v1400_v58  ;;  %v1276_v11 = vadd.f32 1.0, %v1826_v62  ;;  %1853 = vpow2.f32 %v1193_v54  ;;  %v2474_v49 = vpop.f32.mrf.mxu0  ;;  %v956_v58 = vadd.f32 %v2431_v48, %v2422_v25 }
 0x158   : > { %v2476_v7 = vpop.f32.mrf.mxu1  ;;  %v1830_v12 = vpop.eup %1829  ;;  %v1369_v13 = vmul.f32 %v1828_v4, %v985_v59  ;;  %1855 = vrcp.f32 %v1244_v1  ;;  %v1131_v14 = vmul.f32 1.442695, %v1057_v2  ;;  %v2500_v61 = vadd.f32 %v2431_v48, %v2424_v36 }
 0x159   : > { %v1195_v17 = vmul.f32 1.442695, %v1089_v3  ;;  %v1832_v18 = vpop.eup %1831  ;;  %v1401_v50 = vmul.f32 %v1830_v12, %v1017_v9  ;;  %1857 = vrcp.f32 %v1276_v11  ;;  %v649_v8 = vpop.f32.mrf.mxu0  ;;  %v988_v3 = vmax.f32 %v924_v42, 0.0 }
 0x15a   : > { %v809_v21 = vpop.f32.mrf.mxu1  ;;  %v1834_v22 = vpop.eup %1833  ;;  %1433 = vst [vmem:[%s2458_s22 + $0x10] sm:$0xff] %v1369_v13  ;;  %v1245_v55 = vadd.f32 1.0, %v1832_v18  ;;  %1859 = vpow2.f32 %v1131_v14  ;;  %v1058_v27 = vsub.f32 0.0, %v649_v8  ;;  %v1020_v18 = vmax.f32 %v956_v58, 0.0 }
 0x15b   : > { %v1090_v28 = vsub.f32 0.0, %v809_v21  ;;  %v1836_v29 = vpop.eup %1835  ;;  %1465 = vst [vmem:[%s2458_s22 + $0x110] sm:$0xff] %v1401_v50  ;;  %v1277_v32 = vadd.f32 1.0, %v1834_v22  ;;  %1861 = vpow2.f32 %v1195_v17  ;;  %v2484_v33 = vpop.f32.mrf.mxu0  ;;  %v957_v50 = vadd.f32 %v2431_v48, %v2426_v37 }
 0x15c   : > { %v2486_v15 = vpop.f32.mrf.mxu1  ;;  %v1838_v34 = vpop.eup %1837  ;;  %v1370_v56 = vmul.f32 %v1836_v29, %v986_v19  ;;  %1863 = vrcp.f32 %v1245_v55  ;;  %v1133_v35 = vmul.f32 1.442695, %v1058_v27  ;;  %v989_v21 = vmax.f32 %v2500_v61, 0.0 }
 0x15d   : > { %v1197_v38 = vmul.f32 1.442695, %v1090_v28  ;;  %v1840_v39 = vpop.eup %1839  ;;  %v1402_v40 = vmul.f32 %v1838_v34, %v1018_v30  ;;  %1865 = vrcp.f32 %v1277_v32  ;;  %v655_v16 = vpop.f32.mrf.mxu0  ;;  %v926_v28 = vadd.f32 %v2431_v48, %v2433_v51 }
 0x15e   : > { %v815_v63 = vpop.f32.mrf.mxu1  ;;  %v1842_v43 = vpop.eup %1841  ;;  %1434 = vst [vmem:[%s2458_s22 + $0x18] sm:$0xff] %v1370_v56  ;;  %v1246_v46 = vadd.f32 1.0, %v1840_v39  ;;  %1867 = vpow2.f32 %v1133_v35  ;;  %v1059_v47 = vsub.f32 0.0, %v655_v16 }
 0x15f   : > { %v1091_v53 = vsub.f32 0.0, %v815_v63  ;;  %v1844_v54 = vpop.eup %1843  ;;  %1466 = vst [vmem:[%s2458_s22 + $0x118] sm:$0xff] %v1402_v40  ;;  %v1278_v59 = vadd.f32 1.0, %v1842_v43  ;;  %1869 = vpow2.f32 %v1197_v38  ;;  %v2494_v60 = vpop.f32.mrf.mxu0  ;;  %v1021_v40 = vmax.f32 %v957_v50, 0.0 }
 0x160   : > { %v2496_v24 = vpop.f32.mrf.mxu1  ;;  %v1846_v0 = vpop.eup %1845  ;;  %1871 = vrcp.f32 %v1246_v46  ;;  %v1247_v62 = vadd.f32 1.0, %v1844_v54  ;;  %v1135_v1 = vmul.f32 1.442695, %v1059_v47  ;;  %v927_v63 = vadd.f32 %v2431_v48, %v2441_v5 }
 0x161   : > { %v1848_v2 = vpop.eup %1847  ;;  %1873 = vrcp.f32 %v1278_v59  ;;  %v1279_v4 = vadd.f32 1.0, %v1846_v0  ;;  %v1199_v9 = vmul.f32 1.442695, %v1091_v53  ;;  %v659_v25 = vpop.f32.mrf.mxu0  ;;  %v990_v53 = vmax.f32 %v926_v28, 0.0 }
 0x162   : > { %v819_v10 = vpop.f32.mrf.mxu1  ;;  %v1850_v11 = vpop.eup %1849  ;;  %v1371_v12 = vmul.f32 %v1848_v2, %v987_v41  ;;  %1875 = vrcp.f32 %v1247_v62  ;;  %v1060_v13 = vsub.f32 0.0, %v659_v25  ;;  %v958_v41 = vadd.f32 %v2431_v48, %v2435_v52 }
 0x163   : > { %v1092_v14 = vsub.f32 0.0, %v819_v10  ;;  %v1852_v17 = vpop.eup %1851  ;;  %v1403_v36 = vmul.f32 %v1850_v11, %v1019_v57  ;;  %1877 = vrcp.f32 %v1279_v4  ;;  %v2504_v19 = vpop.f32.mrf.mxu0  ;;  %v991_v10 = vmax.f32 %v927_v63, 0.0 }
 0x164   : > { %v2506_v20 = vpop.f32.mrf.mxu1  ;;  %v1854_v8 = vpop.eup %1853  ;;  %1435 = vst [vmem:[%s2458_s22 + $0x20] sm:$0xff] %v1371_v12  ;;  %v1248_v22 = vadd.f32 1.0, %v1852_v17  ;;  %1879 = vpow2.f32 %v1135_v1  ;;  %v1137_v55 = vmul.f32 1.442695, %v1060_v13  ;;  %v1022_v2 = vmax.f32 %v958_v41, 0.0 }
 0x165   : > { %v1856_v27 = vpop.eup %1855  ;;  %1467 = vst [vmem:[%s2458_s22 + $0x120] sm:$0xff] %v1403_v36  ;;  %v1280_v29 = vadd.f32 1.0, %v1854_v8  ;;  %1881 = vpow2.f32 %v1199_v9  ;;  %v1201_v37 = vmul.f32 1.442695, %v1092_v14  ;;  %v665_v30 = vpop.f32.mrf.mxu0  ;;  %v928_v14 = vadd.f32 %v2431_v48, %v2450_v23 }
 0x166   : > { %v825_v31 = vpop.f32.mrf.mxu1  ;;  %v1858_v32 = vpop.eup %1857  ;;  %v1372_v34 = vmul.f32 %v1856_v27, %v988_v3  ;;  %1883 = vrcp.f32 %v1248_v22  ;;  %v1061_v56 = vsub.f32 0.0, %v665_v30  ;;  %v959_v3 = vadd.f32 %v2431_v48, %v2443_v6 }
 0x167   : > { %v1093_v35 = vsub.f32 0.0, %v825_v31  ;;  %v1860_v38 = vpop.eup %1859  ;;  %v1404_v39 = vmul.f32 %v1858_v32, %v1020_v18  ;;  %1885 = vrcp.f32 %v1280_v29  ;;  %v2515_v51 = vpop.f32.mrf.mxu0  ;;  %v960_v29 = vadd.f32 %v2431_v48, %v2452_v26 }
 0x168   : > { %v2517_v42 = vpop.f32.mrf.mxu1  ;;  %v1862_v16 = vpop.eup %1861  ;;  %1436 = vst [vmem:[%s2458_s22 + $0x28] sm:$0xff] %v1372_v34  ;;  %v1249_v43 = vadd.f32 1.0, %v1860_v38  ;;  %1887 = vpow2.f32 %v1137_v55  ;;  %v1139_v46 = vmul.f32 1.442695, %v1061_v56  ;;  %v1023_v28 = vmax.f32 %v959_v3, 0.0 }
 0x169   : > { %v1864_v47 = vpop.eup %1863  ;;  %1468 = vst [vmem:[%s2458_s22 + $0x128] sm:$0xff] %v1404_v39  ;;  %v1281_v54 = vadd.f32 1.0, %v1862_v16  ;;  %1889 = vpow2.f32 %v1201_v37  ;;  %v1203_v57 = vmul.f32 1.442695, %v1093_v35  ;;  %v669_v52 = vpop.f32.mrf.mxu0  ;;  %v992_v38 = vmax.f32 %v928_v14, 0.0 }
 0x16a   : > { %v829_v58 = vpop.f32.mrf.mxu1  ;;  %v1866_v59 = vpop.eup %1865  ;;  %v1373_v0 = vmul.f32 %v1864_v47, %v989_v21  ;;  %1891 = vrcp.f32 %v1249_v43  ;;  %v1062_v61 = vsub.f32 0.0, %v669_v52  ;;  %v929_v26 = vadd.f32 %v2431_v48, %v2464_v44 }
 0x16b   : > { %v1094_v62 = vsub.f32 0.0, %v829_v58  ;;  %v1868_v1 = vpop.eup %1867  ;;  %v1405_v5 = vmul.f32 %v1866_v59, %v1021_v40  ;;  %1893 = vrcp.f32 %v1281_v54  ;;  %v2525_v4 = vpop.f32.mrf.mxu0  ;;  %v1024_v47 = vmax.f32 %v960_v29, 0.0 }
 0x16c   : > { %v2527_v9 = vpop.f32.mrf.mxu1  ;;  %v1870_v25 = vpop.eup %1869  ;;  %1437 = vst [vmem:[%s2458_s22 + $0x30] sm:$0xff] %v1373_v0  ;;  %v1250_v11 = vadd.f32 1.0, %v1868_v1  ;;  %1895 = vpow2.f32 %v1139_v46  ;;  %v1141_v12 = vmul.f32 1.442695, %v1062_v61  ;;  %v993_v1 = vmax.f32 %v929_v26, 0.0 }
 0x16d   : > { %v1872_v13 = vpop.eup %1871  ;;  %1469 = vst [vmem:[%s2458_s22 + $0x130] sm:$0xff] %v1405_v5  ;;  %v1282_v17 = vadd.f32 1.0, %v1870_v25  ;;  %1897 = vpow2.f32 %v1203_v57  ;;  %v1205_v36 = vmul.f32 1.442695, %v1094_v62  ;;  %v675_v6 = vpop.f32.mrf.mxu0  ;;  %v930_v5 = vadd.f32 %v2431_v48, %v2474_v49 }
 0x16e   : > { %v835_v18 = vpop.f32.mrf.mxu1  ;;  %v1874_v50 = vpop.eup %1873  ;;  %v1374_v8 = vmul.f32 %v1872_v13, %v990_v53  ;;  %1899 = vrcp.f32 %v1250_v11  ;;  %v1063_v21 = vsub.f32 0.0, %v675_v6  ;;  %v961_v53 = vadd.f32 %v2431_v48, %v2466_v45 }
 0x16f   : > { %v1095_v22 = vsub.f32 0.0, %v835_v18  ;;  %v1876_v55 = vpop.eup %1875  ;;  %v1406_v27 = vmul.f32 %v1874_v50, %v1022_v2  ;;  %1901 = vrcp.f32 %v1282_v17  ;;  %v2535_v23 = vpop.f32.mrf.mxu0  ;;  %v962_v14 = vadd.f32 %v2431_v48, %v2476_v7 }
 0x170   : > { %v2537_v37 = vpop.f32.mrf.mxu1  ;;  %v1878_v30 = vpop.eup %1877  ;;  %1438 = vst [vmem:[%s2458_s22 + $0x38] sm:$0xff] %v1374_v8  ;;  %v1375_v31 = vmul.f32 %v1876_v55, %v991_v10  ;;  %1903 = vpow2.f32 %v1141_v12  ;;  %v1143_v32 = vmul.f32 1.442695, %v1063_v21  ;;  %v1025_v13 = vmax.f32 %v961_v53, 0.0 }
 0x171   : > { %v1207_v34 = vmul.f32 1.442695, %v1095_v22  ;;  %v1880_v56 = vpop.eup %1879  ;;  %1470 = vst [vmem:[%s2458_s22 + $0x138] sm:$0xff] %v1406_v27  ;;  %v1407_v35 = vmul.f32 %v1878_v30, %v1023_v28  ;;  %1905 = vpow2.f32 %v1205_v36  ;;  %v679_v39 = vpop.f32.mrf.mxu0  ;;  %v994_v55 = vmax.f32 %v930_v5, 0.0 }
 0x172   : > { %v839_v40 = vpop.f32.mrf.mxu1  ;;  %v1882_v41 = vpop.eup %1881  ;;  %1439 = vst [vmem:[%s2458_s22 + $0x40] sm:$0xff] %v1375_v31  ;;  %v1251_v16 = vadd.f32 1.0, %v1880_v56  ;;  %1907 = vpow2.f32 %v1143_v32  ;;  %v1064_v63 = vsub.f32 0.0, %v679_v39  ;;  %v931_v27 = vadd.f32 %v2431_v48, %v2484_v33 }
 0x173   : > { %v1096_v43 = vsub.f32 0.0, %v839_v40  ;;  %v1884_v46 = vpop.eup %1883  ;;  %1471 = vst [vmem:[%s2458_s22 + $0x140] sm:$0xff] %v1407_v35  ;;  %v1283_v54 = vadd.f32 1.0, %v1882_v41  ;;  %1909 = vpow2.f32 %v1207_v34  ;;  %v2547_v57 = vpop.f32.mrf.mxu0  ;;  %v1026_v56 = vmax.f32 %v962_v14, 0.0 }
 0x174   : > { %v2549_v44 = vpop.f32.mrf.mxu1  ;;  %v1886_v52 = vpop.eup %1885  ;;  %v1376_v58 = vmul.f32 %v1884_v46, %v992_v38  ;;  %1911 = vrcp.f32 %v1251_v16  ;;  %v1145_v59 = vmul.f32 1.442695, %v1064_v63  ;;  %v963_v35 = vadd.f32 %v2431_v48, %v2486_v15 }
 0x175   : > { %v1209_v0 = vmul.f32 1.442695, %v1096_v43  ;;  %v1888_v61 = vpop.eup %1887  ;;  %v1408_v62 = vmul.f32 %v1886_v52, %v1024_v47  ;;  %1913 = vrcp.f32 %v1283_v54  ;;  %v685_v45 = vpop.f32.mrf.mxu0  ;;  %v995_v46 = vmax.f32 %v931_v27, 0.0 }
 0x176   : > { %v845_v2 = vpop.f32.mrf.mxu1  ;;  %v1890_v3 = vpop.eup %1889  ;;  %1440 = vst [vmem:[%s2458_s22 + $0x48] sm:$0xff] %v1376_v58  ;;  %v1252_v25 = vadd.f32 1.0, %v1888_v61  ;;  %1915 = vpow2.f32 %v1145_v59  ;;  %v1065_v10 = vsub.f32 0.0, %v685_v45  ;;  %v932_v47 = vadd.f32 %v2431_v48, %v2494_v60 }
 0x177   : > { %v1097_v11 = vsub.f32 0.0, %v845_v2  ;;  %v1892_v12 = vpop.eup %1891  ;;  %1472 = vst [vmem:[%s2458_s22 + $0x148] sm:$0xff] %v1408_v62  ;;  %v1284_v17 = vadd.f32 1.0, %v1890_v3  ;;  %1917 = vpow2.f32 %v1209_v0  ;;  %v2557_v36 = vpop.f32.mrf.mxu0  ;;  %v1027_v61 = vmax.f32 %v963_v35, 0.0 }
 0x178   : > { %v2559_v49 = vpop.f32.mrf.mxu1  ;;  %v1894_v6 = vpop.eup %1893  ;;  %v1377_v18 = vmul.f32 %v1892_v12, %v993_v1  ;;  %1919 = vrcp.f32 %v1252_v25  ;;  %v1147_v50 = vmul.f32 1.442695, %v1065_v10  ;;  %v964_v62 = vadd.f32 %v2431_v48, %v2496_v24 }
 0x179   : > { %v1211_v8 = vmul.f32 1.442695, %v1097_v11  ;;  %v1896_v21 = vpop.eup %1895  ;;  %v1409_v22 = vmul.f32 %v1894_v6, %v1025_v13  ;;  %1921 = vrcp.f32 %v1284_v17  ;;  %v689_v7 = vpop.f32.mrf.mxu0  ;;  %v2583_v2 = vadd.f32 %v2431_v48, %v2504_v19 }
 0x17a   : > { %v849_v28 = vpop.f32.mrf.mxu1  ;;  %v1898_v29 = vpop.eup %1897  ;;  %1441 = vst [vmem:[%s2458_s22 + $0x50] sm:$0xff] %v1377_v18  ;;  %v1253_v30 = vadd.f32 1.0, %v1896_v21  ;;  %1923 = vpow2.f32 %v1147_v50  ;;  %v1066_v31 = vsub.f32 0.0, %v689_v7  ;;  %v996_v11 = vmax.f32 %v932_v47, 0.0 }
 0x17b   : > { %v1098_v32 = vsub.f32 0.0, %v849_v28  ;;  %v1900_v34 = vpop.eup %1899  ;;  %1473 = vst [vmem:[%s2458_s22 + $0x150] sm:$0xff] %v1409_v22  ;;  %v1285_v38 = vadd.f32 1.0, %v1898_v29  ;;  %1925 = vpow2.f32 %v1211_v8  ;;  %v2567_v26 = vpop.f32.mrf.mxu0  ;;  %v1028_v21 = vmax.f32 %v964_v62, 0.0 }
 0x17c   : > { %v2569_v33 = vpop.f32.mrf.mxu1  ;;  %v1902_v39 = vpop.eup %1901  ;;  %v1378_v40 = vmul.f32 %v1900_v34, %v994_v55  ;;  %1927 = vrcp.f32 %v1253_v30  ;;  %v1149_v41 = vmul.f32 1.442695, %v1066_v31  ;;  %v965_v22 = vadd.f32 %v2431_v48, %v2506_v20 }
 0x17d   : > { %v1213_v16 = vmul.f32 1.442695, %v1098_v32  ;;  %v1904_v63 = vpop.eup %1903  ;;  %v1410_v43 = vmul.f32 %v1902_v39, %v1026_v56  ;;  %1929 = vrcp.f32 %v1285_v38  ;;  %v695_v15 = vpop.f32.mrf.mxu0  ;;  %v997_v28 = vmax.f32 %v2583_v2, 0.0 }
 0x17e   : > { %v855_v53 = vpop.f32.mrf.mxu1  ;;  %v1906_v54 = vpop.eup %1905  ;;  %1442 = vst [vmem:[%s2458_s22 + $0x58] sm:$0xff] %v1378_v40  ;;  %v1254_v52 = vadd.f32 1.0, %v1904_v63  ;;  %1931 = vpow2.f32 %v1149_v41  ;;  %v1067_v58 = vsub.f32 0.0, %v695_v15  ;;  %v934_v32 = vadd.f32 %v2431_v48, %v2515_v51 }
 0x17f   : > { %v1099_v59 = vsub.f32 0.0, %v855_v53  ;;  %v1908_v0 = vpop.eup %1907  ;;  %1474 = vst [vmem:[%s2458_s22 + $0x158] sm:$0xff] %v1410_v43  ;;  %v1286_v1 = vadd.f32 1.0, %v1906_v54  ;;  %1933 = vpow2.f32 %v1213_v16  ;;  %v2577_v5 = vpop.f32.mrf.mxu0  ;;  %v1029_v43 = vmax.f32 %v965_v22, 0.0 }
 0x180   : > { %v2579_v60 = vpop.f32.mrf.mxu1  ;;  %v1910_v45 = vpop.eup %1909  ;;  %1935 = vrcp.f32 %v1254_v52  ;;  %v1255_v3 = vadd.f32 1.0, %v1908_v0  ;;  %v1151_v25 = vmul.f32 1.442695, %v1067_v58  ;;  %v935_v53 = vadd.f32 %v2431_v48, %v2525_v4 }
 0x181   : > { %v1912_v10 = vpop.eup %1911  ;;  %1937 = vrcp.f32 %v1286_v1  ;;  %v1287_v12 = vadd.f32 1.0, %v1910_v45  ;;  %v1215_v13 = vmul.f32 1.442695, %v1099_v59  ;;  %v699_v24 = vpop.f32.mrf.mxu0  ;;  %v998_v59 = vmax.f32 %v934_v32, 0.0 }
 0x182   : > { %v859_v14 = vpop.f32.mrf.mxu1  ;;  %v1914_v17 = vpop.eup %1913  ;;  %v1379_v6 = vmul.f32 %v1912_v10, %v995_v46  ;;  %1939 = vrcp.f32 %v1255_v3  ;;  %v1068_v18 = vsub.f32 0.0, %v699_v24  ;;  %v966_v46 = vadd.f32 %v2431_v48, %v2517_v42 }
 0x183   : > { %v1100_v50 = vsub.f32 0.0, %v859_v14  ;;  %v1916_v8 = vpop.eup %1915  ;;  %v1411_v19 = vmul.f32 %v1914_v17, %v1027_v61  ;;  %1941 = vrcp.f32 %v1287_v12  ;;  %v2587_v55 = vpop.f32.mrf.mxu0  ;;  %v999_v14 = vmax.f32 %v935_v53, 0.0 }
 0x184   : > { %v2589_v27 = vpop.f32.mrf.mxu1  ;;  %v1918_v7 = vpop.eup %1917  ;;  %1443 = vst [vmem:[%s2458_s22 + $0x60] sm:$0xff] %v1379_v6  ;;  %v1256_v29 = vadd.f32 1.0, %v1916_v8  ;;  %1943 = vpow2.f32 %v1151_v25  ;;  %v1153_v30 = vmul.f32 1.442695, %v1068_v18  ;;  %v1030_v10 = vmax.f32 %v966_v46, 0.0 }
 0x185   : > { %v1920_v31 = vpop.eup %1919  ;;  %1475 = vst [vmem:[%s2458_s22 + $0x160] sm:$0xff] %v1411_v19  ;;  %v1288_v34 = vadd.f32 1.0, %v1918_v7  ;;  %1945 = vpow2.f32 %v1215_v13  ;;  %v1217_v20 = vmul.f32 1.442695, %v1100_v50  ;;  %v705_v56 = vpop.f32.mrf.mxu0  ;;  %v936_v50 = vadd.f32 %v2431_v48, %v2535_v23 }
 0x186   : > { %v865_v35 = vpop.f32.mrf.mxu1  ;;  %v1922_v38 = vpop.eup %1921  ;;  %v1380_v39 = vmul.f32 %v1920_v31, %v996_v11  ;;  %1947 = vrcp.f32 %v1256_v29  ;;  %v1069_v40 = vsub.f32 0.0, %v705_v56  ;;  %v967_v11 = vadd.f32 %v2431_v48, %v2527_v9 }
 0x187   : > { %v1101_v41 = vsub.f32 0.0, %v865_v35  ;;  %v1924_v16 = vpop.eup %1923  ;;  %v1412_v63 = vmul.f32 %v1922_v38, %v1028_v21  ;;  %1949 = vrcp.f32 %v1288_v34  ;;  %v2598_v51 = vpop.f32.mrf.mxu0  ;;  %v968_v34 = vadd.f32 %v2431_v48, %v2537_v37 }
 0x188   : > { %v2600_v47 = vpop.f32.mrf.mxu1  ;;  %v1926_v15 = vpop.eup %1925  ;;  %1444 = vst [vmem:[%s2458_s22 + $0x68] sm:$0xff] %v1380_v39  ;;  %v1257_v54 = vadd.f32 1.0, %v1924_v16  ;;  %1951 = vpow2.f32 %v1153_v30  ;;  %v1155_v52 = vmul.f32 1.442695, %v1069_v40  ;;  %v1031_v32 = vmax.f32 %v967_v11, 0.0 }
 0x189   : > { %v1928_v58 = vpop.eup %1927  ;;  %1476 = vst [vmem:[%s2458_s22 + $0x168] sm:$0xff] %v1412_v63  ;;  %v1289_v0 = vadd.f32 1.0, %v1926_v15  ;;  %1953 = vpow2.f32 %v1217_v20  ;;  %v1219_v61 = vmul.f32 1.442695, %v1101_v41  ;;  %v709_v42 = vpop.f32.mrf.mxu0  ;;  %v1000_v16 = vmax.f32 %v936_v50, 0.0 }
 0x18a   : > { %v869_v62 = vpop.f32.mrf.mxu1  ;;  %v1930_v1 = vpop.eup %1929  ;;  %v1381_v45 = vmul.f32 %v1928_v58, %v997_v28  ;;  %1955 = vrcp.f32 %v1257_v54  ;;  %v1070_v2 = vsub.f32 0.0, %v709_v42  ;;  %v937_v37 = vadd.f32 %v2431_v48, %v2547_v57 }
 0x18b   : > { %v1102_v3 = vsub.f32 0.0, %v869_v62  ;;  %v1932_v25 = vpop.eup %1931  ;;  %v1413_v4 = vmul.f32 %v1930_v1, %v1029_v43  ;;  %1957 = vrcp.f32 %v1289_v0  ;;  %v2608_v12 = vpop.f32.mrf.mxu0  ;;  %v1032_v58 = vmax.f32 %v968_v34, 0.0 }
 0x18c   : > { %v2610_v13 = vpop.f32.mrf.mxu1  ;;  %v1934_v24 = vpop.eup %1933  ;;  %1445 = vst [vmem:[%s2458_s22 + $0x70] sm:$0xff] %v1381_v45  ;;  %v1258_v17 = vadd.f32 1.0, %v1932_v25  ;;  %1959 = vpow2.f32 %v1155_v52  ;;  %v1157_v6 = vmul.f32 1.442695, %v1070_v2  ;;  %v1001_v25 = vmax.f32 %v937_v37, 0.0 }
 0x18d   : > { %v1936_v18 = vpop.eup %1935  ;;  %1477 = vst [vmem:[%s2458_s22 + $0x170] sm:$0xff] %v1413_v4  ;;  %v1290_v8 = vadd.f32 1.0, %v1934_v24  ;;  %1961 = vpow2.f32 %v1219_v61  ;;  %v1221_v19 = vmul.f32 1.442695, %v1102_v3  ;;  %v715_v9 = vpop.f32.mrf.mxu0  ;;  %v938_v4 = vadd.f32 %v2431_v48, %v2557_v36 }
 0x18e   : > { %v875_v21 = vpop.f32.mrf.mxu1  ;;  %v1938_v22 = vpop.eup %1937  ;;  %v1382_v7 = vmul.f32 %v1936_v18, %v998_v59  ;;  %1963 = vrcp.f32 %v1258_v17  ;;  %v1071_v28 = vsub.f32 0.0, %v715_v9  ;;  %v969_v59 = vadd.f32 %v2431_v48, %v2549_v44 }
 0x18f   : > { %v1103_v29 = vsub.f32 0.0, %v875_v21  ;;  %v1940_v30 = vpop.eup %1939  ;;  %v1414_v31 = vmul.f32 %v1938_v22, %v1030_v10  ;;  %1965 = vrcp.f32 %v1290_v8  ;;  %v2618_v23 = vpop.f32.mrf.mxu0  ;;  %v970_v50 = vadd.f32 %v2431_v48, %v2559_v49  ;;  %v2647_v48 = vld [vmem:[%s2793_s2] ss:$0 sm:$0xff] }
 0x190   : > { %v2620_v20 = vpop.f32.mrf.mxu1  ;;  %v1942_v56 = vpop.eup %1941  ;;  %1446 = vst [vmem:[%s2458_s22 + $0x78] sm:$0xff] %v1382_v7  ;;  %v1383_v35 = vmul.f32 %v1940_v30, %v999_v14  ;;  %1967 = vpow2.f32 %v1157_v6  ;;  %v1159_v38 = vmul.f32 1.442695, %v1071_v28  ;;  %v1033_v18 = vmax.f32 %v969_v59, 0.0 }
 0x191   : > { %v1223_v39 = vmul.f32 1.442695, %v1103_v29  ;;  %v1944_v40 = vpop.eup %1943  ;;  %1478 = vst [vmem:[%s2458_s22 + $0x178] sm:$0xff] %v1414_v31  ;;  %v1415_v41 = vmul.f32 %v1942_v56, %v1031_v32  ;;  %1969 = vpow2.f32 %v1221_v19  ;;  %v719_v63 = vpop.f32.mrf.mxu0  ;;  %v1002_v30 = vmax.f32 %v938_v4, 0.0 }
 0x192   : > { %v879_v43 = vpop.f32.mrf.mxu1  ;;  %v1946_v46 = vpop.eup %1945  ;;  %1447 = vst [vmem:[%s2458_s22 + $0x80] sm:$0xff] %v1383_v35  ;;  %v1259_v15 = vadd.f32 1.0, %v1944_v40  ;;  %1971 = vpow2.f32 %v1159_v38  ;;  %v1072_v53 = vsub.f32 0.0, %v719_v63  ;;  %v939_v49 = vadd.f32 %v2647_v48, %v2567_v26 }
 0x193   : > { %v1104_v54 = vsub.f32 0.0, %v879_v43  ;;  %v1948_v52 = vpop.eup %1947  ;;  %1479 = vst [vmem:[%s2458_s22 + $0x180] sm:$0xff] %v1415_v41  ;;  %v1291_v0 = vadd.f32 1.0, %v1946_v46  ;;  %1973 = vpow2.f32 %v1223_v39  ;;  %v2630_v61 = vpop.f32.mrf.mxu0  ;;  %v1034_v40 = vmax.f32 %v970_v50, 0.0 }
 0x194   : > { %v2632_v57 = vpop.f32.mrf.mxu1  ;;  %v1950_v42 = vpop.eup %1949  ;;  %v1384_v62 = vmul.f32 %v1948_v52, %v1000_v16  ;;  %1975 = vrcp.f32 %v1259_v15  ;;  %v1161_v1 = vmul.f32 1.442695, %v1072_v53  ;;  %v971_v41 = vadd.f32 %v2647_v48, %v2569_v33 }
 0x195   : > { %v1225_v45 = vmul.f32 1.442695, %v1104_v54  ;;  %v1952_v2 = vpop.eup %1951  ;;  %v1416_v3 = vmul.f32 %v1950_v42, %v1032_v58  ;;  %1977 = vrcp.f32 %v1291_v0  ;;  %v725_v44 = vpop.f32.mrf.mxu0  ;;  %v1003_v52 = vmax.f32 %v939_v49, 0.0 }
 0x196   : > { %v885_v10 = vpop.f32.mrf.mxu1  ;;  %v1954_v11 = vpop.eup %1953  ;;  %1448 = vst [vmem:[%s2458_s22 + $0x88] sm:$0xff] %v1384_v62  ;;  %v1260_v24 = vadd.f32 1.0, %v1952_v2  ;;  %1979 = vpow2.f32 %v1161_v1  ;;  %v1073_v14 = vsub.f32 0.0, %v725_v44  ;;  %v940_v2 = vadd.f32 %v2647_v48, %v2577_v5 }
 0x197   : > { %v1105_v17 = vsub.f32 0.0, %v885_v10  ;;  %v1956_v6 = vpop.eup %1955  ;;  %1480 = vst [vmem:[%s2458_s22 + $0x188] sm:$0xff] %v1416_v3  ;;  %v1292_v8 = vadd.f32 1.0, %v1954_v11  ;;  %1981 = vpow2.f32 %v1225_v45  ;;  %v2640_v19 = vpop.f32.mrf.mxu0  ;;  %v1035_v45 = vmax.f32 %v971_v41, 0.0 }
 0x198   : > { %v2642_v36 = vpop.f32.mrf.mxu1  ;;  %v1958_v9 = vpop.eup %1957  ;;  %v1385_v21 = vmul.f32 %v1956_v6, %v1001_v25  ;;  %1983 = vrcp.f32 %v1260_v24  ;;  %v1163_v22 = vmul.f32 1.442695, %v1073_v14  ;;  %v972_v10 = vadd.f32 %v2647_v48, %v2579_v60 }
 0x199   : > { %v1227_v7 = vmul.f32 1.442695, %v1105_v17  ;;  %v1960_v28 = vpop.eup %1959  ;;  %v1417_v29 = vmul.f32 %v1958_v9, %v1033_v18  ;;  %1985 = vrcp.f32 %v1292_v8  ;;  %v729_v31 = vpop.f32.mrf.mxu0  ;;  %v941_v17 = vadd.f32 %v2647_v48, %v2587_v55 }
 0x19a   : > { %v889_v32 = vpop.f32.mrf.mxu1  ;;  %v1962_v34 = vpop.eup %1961  ;;  %1449 = vst [vmem:[%s2458_s22 + $0x90] sm:$0xff] %v1385_v21  ;;  %v1261_v56 = vadd.f32 1.0, %v1960_v28  ;;  %1987 = vpow2.f32 %v1163_v22  ;;  %v1074_v35 = vsub.f32 0.0, %v729_v31  ;;  %v1004_v28 = vmax.f32 %v940_v2, 0.0 }
 0x19b   : > { %v1106_v38 = vsub.f32 0.0, %v889_v32  ;;  %v1964_v39 = vpop.eup %1963  ;;  %1481 = vst [vmem:[%s2458_s22 + $0x190] sm:$0xff] %v1417_v29  ;;  %v1293_v16 = vadd.f32 1.0, %v1962_v34  ;;  %1989 = vpow2.f32 %v1227_v7  ;;  %v2655_v37 = vpop.f32.mrf.mxu0  ;;  %v973_v29 = vadd.f32 %v2647_v48, %v2589_v27 }
 0x19c   : > { %v2657_v26 = vpop.f32.mrf.mxu1  ;;  %v1966_v63 = vpop.eup %1965  ;;  %v1386_v43 = vmul.f32 %v1964_v39, %v1002_v30  ;;  %1991 = vrcp.f32 %v1261_v56  ;;  %v1165_v46 = vmul.f32 1.442695, %v1074_v35  ;;  %v1036_v31 = vmax.f32 %v972_v10, 0.0 }
 0x19d   : > { %v1229_v15 = vmul.f32 1.442695, %v1106_v38  ;;  %v1968_v53 = vpop.eup %1967  ;;  %v1418_v54 = vmul.f32 %v1966_v63, %v1034_v40  ;;  %1993 = vrcp.f32 %v1293_v16  ;;  %v735_v58 = vpop.f32.mrf.mxu0  ;;  %v1005_v35 = vmax.f32 %v941_v17, 0.0 }
 0x19e   : > { %v895_v59 = vpop.f32.mrf.mxu1  ;;  %v1970_v33 = vpop.eup %1969  ;;  %1450 = vst [vmem:[%s2458_s22 + $0x98] sm:$0xff] %v1386_v43  ;;  %v1262_v0 = vadd.f32 1.0, %v1968_v53  ;;  %1995 = vpow2.f32 %v1165_v46  ;;  %v1075_v42 = vsub.f32 0.0, %v735_v58  ;;  %v1037_v53 = vmax.f32 %v973_v29, 0.0 }
 0x19f   : > { %v1107_v62 = vsub.f32 0.0, %v895_v59  ;;  %v1972_v1 = vpop.eup %1971  ;;  %1482 = vst [vmem:[%s2458_s22 + $0x198] sm:$0xff] %v1418_v54  ;;  %v1294_v3 = vadd.f32 1.0, %v1970_v33  ;;  %1997 = vpow2.f32 %v1229_v15  ;;  %v2663_v25 = vpop.f32.mrf.mxu0  ;;  %v942_v54 = vadd.f32 %v2647_v48, %v2598_v51 }
 0x1a0   : > { %v2665_v4 = vpop.f32.mrf.mxu1  ;;  %v1974_v44 = vpop.eup %1973  ;;  %1999 = vrcp.f32 %v1262_v0  ;;  %v1263_v11 = vadd.f32 1.0, %v1972_v1  ;;  %v1167_v24 = vmul.f32 1.442695, %v1075_v42  ;;  %v974_v33 = vadd.f32 %v2647_v48, %v2600_v47 }
 0x1a1   : > { %v1976_v14 = vpop.eup %1975  ;;  %2001 = vrcp.f32 %v1294_v3  ;;  %v1295_v6 = vadd.f32 1.0, %v1974_v44  ;;  %v1231_v5 = vmul.f32 1.442695, %v1107_v62  ;;  %v739_v18 = vpop.f32.mrf.mxu0  ;;  %v943_v1 = vadd.f32 %v2647_v48, %v2608_v12 }
 0x1a2   : > { %v899_v50 = vpop.f32.mrf.mxu1  ;;  %v1978_v8 = vpop.eup %1977  ;;  %v1387_v9 = vmul.f32 %v1976_v14, %v1003_v52  ;;  %2003 = vrcp.f32 %v1263_v11  ;;  %v1076_v21 = vsub.f32 0.0, %v739_v18  ;;  %v975_v17 = vadd.f32 %v2647_v48, %v2610_v13 }
 0x1a3   : > { %v1108_v22 = vsub.f32 0.0, %v899_v50  ;;  %v1980_v60 = vpop.eup %1979  ;;  %v1419_v7 = vmul.f32 %v1978_v8, %v1035_v45  ;;  %2005 = vrcp.f32 %v1295_v6  ;;  %v2673_v55 = vpop.f32.mrf.mxu0  ;;  %v1006_v12 = vmax.f32 %v942_v54, 0.0 }
 0x1a4   : > { %v2675_v30 = vpop.f32.mrf.mxu1  ;;  %v1982_v49 = vpop.eup %1981  ;;  %1451 = vst [vmem:[%s2458_s22 + $0xa0] sm:$0xff] %v1387_v9  ;;  %v1264_v32 = vadd.f32 1.0, %v1980_v60  ;;  %2007 = vpow2.f32 %v1167_v24  ;;  %v1169_v34 = vmul.f32 1.442695, %v1076_v21  ;;  %v1038_v8 = vmax.f32 %v974_v33, 0.0 }
 0x1a5   : > { %v1984_v56 = vpop.eup %1983  ;;  %1483 = vst [vmem:[%s2458_s22 + $0x1a0] sm:$0xff] %v1419_v7  ;;  %v1296_v38 = vadd.f32 1.0, %v1982_v49  ;;  %2009 = vpow2.f32 %v1231_v5  ;;  %v1233_v39 = vmul.f32 1.442695, %v1108_v22  ;;  %v745_v40 = vpop.f32.mrf.mxu0  ;;  %v1007_v7 = vmax.f32 %v943_v1, 0.0 }
 0x1a6   : > { %v905_v27 = vpop.f32.mrf.mxu1  ;;  %v1986_v41 = vpop.eup %1985  ;;  %v1388_v16 = vmul.f32 %v1984_v56, %v1004_v28  ;;  %2011 = vrcp.f32 %v1264_v32  ;;  %v1077_v63 = vsub.f32 0.0, %v745_v40  ;;  %v944_v13 = vadd.f32 %v2647_v48, %v2618_v23 }
 0x1a7   : > { %v1109_v43 = vsub.f32 0.0, %v905_v27  ;;  %v1988_v46 = vpop.eup %1987  ;;  %v1420_v15 = vmul.f32 %v1986_v41, %v1036_v31  ;;  %2013 = vrcp.f32 %v1296_v38  ;;  %v2681_v52 = vpop.f32.mrf.mxu0  ;;  %v1039_v49 = vmax.f32 %v975_v17, 0.0 }
 0x1a8   : > { %v2683_v58 = vpop.f32.mrf.mxu1  ;;  %v1990_v59 = vpop.eup %1989  ;;  %1452 = vst [vmem:[%s2458_s22 + $0xa8] sm:$0xff] %v1388_v16  ;;  %v1265_v0 = vadd.f32 1.0, %v1988_v46  ;;  %2015 = vpow2.f32 %v1169_v34  ;;  %v1171_v42 = vmul.f32 1.442695, %v1077_v63  ;;  %v976_v31 = vadd.f32 %v2647_v48, %v2620_v20 }
 0x1a9   : > { %v1992_v62 = vpop.eup %1991  ;;  %1484 = vst [vmem:[%s2458_s22 + $0x1a8] sm:$0xff] %v1420_v15  ;;  %v1297_v51 = vadd.f32 1.0, %v1990_v59  ;;  %2017 = vpow2.f32 %v1233_v39  ;;  %v1235_v45 = vmul.f32 1.442695, %v1109_v43  ;;  %v749_v2 = vpop.f32.mrf.mxu0  ;;  %v1008_v23 = vmax.f32 %v944_v13, 0.0 }
 0x1aa   : > { %v909_v3 = vpop.f32.mrf.mxu1  ;;  %v1994_v44 = vpop.eup %1993  ;;  %v1389_v10 = vmul.f32 %v1992_v62, %v1005_v35  ;;  %2019 = vrcp.f32 %v1265_v0  ;;  %v1078_v11 = vsub.f32 0.0, %v749_v2  ;;  %v945_v39 = vadd.f32 %v2647_v48, %v2630_v61 }
 0x1ab   : > { %v1110_v47 = vsub.f32 0.0, %v909_v3  ;;  %v1996_v24 = vpop.eup %1995  ;;  %v1421_v14 = vmul.f32 %v1994_v44, %v1037_v53  ;;  %2021 = vrcp.f32 %v1297_v51  ;;  %v1040_v20 = vmax.f32 %v976_v31, 0.0 }
 0x1ac   : > { %v1998_v6 = vpop.eup %1997  ;;  %1453 = vst [vmem:[%s2458_s22 + $0xb0] sm:$0xff] %v1389_v10  ;;  %v1266_v5 = vadd.f32 1.0, %v1996_v24  ;;  %2023 = vpow2.f32 %v1171_v42  ;;  %v1173_v18 = vmul.f32 1.442695, %v1078_v11  ;;  %v977_v41 = vadd.f32 %v2647_v48, %v2632_v57 }
 0x1ad   : > { %v2000_v50 = vpop.eup %1999  ;;  %1485 = vst [vmem:[%s2458_s22 + $0x1b0] sm:$0xff] %v1421_v14  ;;  %v1298_v9 = vadd.f32 1.0, %v1998_v6  ;;  %2025 = vpow2.f32 %v1235_v45  ;;  %v1237_v21 = vmul.f32 1.442695, %v1110_v47  ;;  %v1009_v54 = vmax.f32 %v945_v39, 0.0 }
 0x1ae   : > { %v2002_v22 = vpop.eup %2001  ;;  %v1390_v60 = vmul.f32 %v2000_v50, %v1006_v12  ;;  %2027 = vrcp.f32 %v1266_v5  ;;  %v946_v61 = vadd.f32 %v2647_v48, %v2640_v19  ;;  %v1041_v0 = vmax.f32 %v977_v41, 0.0 }
 0x1af   : > { %v2004_v28 = vpop.eup %2003  ;;  %v1422_v29 = vmul.f32 %v2002_v22, %v1038_v8  ;;  %2029 = vrcp.f32 %v1298_v9  ;;  %v978_v57 = vadd.f32 %v2647_v48, %v2642_v36  ;;  %v947_v36 = vadd.f32 %v2647_v48, %v2655_v37 }
 0x1b0   : > { %v2006_v32 = vpop.eup %2005  ;;  %1454 = vst [vmem:[%s2458_s22 + $0xb8] sm:$0xff] %v1390_v60  ;;  %v1391_v34 = vmul.f32 %v2004_v28, %v1007_v7  ;;  %2031 = vpow2.f32 %v1173_v18  ;;  %v1010_v3 = vmax.f32 %v946_v61, 0.0  ;;  %v979_v6 = vadd.f32 %v2647_v48, %v2657_v26 }
 0x1b1   : > { %v2008_v56 = vpop.eup %2007  ;;  %1486 = vst [vmem:[%s2458_s22 + $0x1b8] sm:$0xff] %v1422_v29  ;;  %v1423_v35 = vmul.f32 %v2006_v32, %v1039_v49  ;;  %2033 = vpow2.f32 %v1237_v21  ;;  %v1042_v10 = vmax.f32 %v978_v57, 0.0  ;;  %v1011_v50 = vmax.f32 %v947_v36, 0.0 }
 0x1b2   : > { %v2010_v38 = vpop.eup %2009  ;;  %1455 = vst [vmem:[%s2458_s22 + $0xc0] sm:$0xff] %v1391_v34  ;;  %v1267_v40 = vadd.f32 1.0, %v2008_v56  ;;  %v948_v8 = vadd.f32 %v2647_v48, %v2663_v25  ;;  %v1043_v9 = vmax.f32 %v979_v6, 0.0  ;;  %v980_v21 = vadd.f32 %v2647_v48, %v2665_v4 }
 0x1b3   : > { %v2012_v27 = vpop.eup %2011  ;;  %1487 = vst [vmem:[%s2458_s22 + $0x1c0] sm:$0xff] %v1423_v35  ;;  %v1299_v16 = vadd.f32 1.0, %v2010_v38  ;;  %v949_v13 = vadd.f32 %v2647_v48, %v2673_v55  ;;  %v981_v29 = vadd.f32 %v2647_v48, %v2675_v30  ;;  %v950_v34 = vadd.f32 %v2647_v48, %v2681_v52 }
 0x1b4   : > { %v2014_v63 = vpop.eup %2013  ;;  %v1392_v43 = vmul.f32 %v2012_v27, %v1008_v23  ;;  %2035 = vrcp.f32 %v1267_v40  ;;  %v1012_v7 = vmax.f32 %v948_v8, 0.0  ;;  %v1044_v25 = vmax.f32 %v980_v21, 0.0 }
 0x1b5   : > { %v2016_v46 = vpop.eup %2015  ;;  %v1424_v15 = vmul.f32 %v2014_v63, %v1040_v20  ;;  %2037 = vrcp.f32 %v1299_v16  ;;  %v1013_v32 = vmax.f32 %v949_v13, 0.0  ;;  %v1045_v55 = vmax.f32 %v981_v29, 0.0 }
 0x1b6   : > { %v2018_v53 = vpop.eup %2017  ;;  %1456 = vst [vmem:[%s2458_s22 + $0xc8] sm:$0xff] %v1392_v43  ;;  %v1268_v59 = vadd.f32 1.0, %v2016_v46  ;;  %v982_v35 = vadd.f32 %v2647_v48, %v2683_v58  ;;  %v1014_v39 = vmax.f32 %v950_v34, 0.0 }
 0x1b7   : > { %v2020_v33 = vpop.eup %2019  ;;  %1488 = vst [vmem:[%s2458_s22 + $0x1c8] sm:$0xff] %v1424_v15  ;;  %v1300_v42 = vadd.f32 1.0, %v2018_v53 }
 0x1b8   : > { %v2022_v62 = vpop.eup %2021  ;;  %v1393_v1 = vmul.f32 %v2020_v33, %v1009_v54  ;;  %2039 = vrcp.f32 %v1268_v59  ;;  %v1046_v52 = vmax.f32 %v982_v35, 0.0 }
 0x1b9   : > { %v2024_v51 = vpop.eup %2023  ;;  %v1425_v45 = vmul.f32 %v2022_v62, %v1041_v0  ;;  %2041 = vrcp.f32 %v1300_v42 }
 0x1ba   : > { %v2026_v2 = vpop.eup %2025  ;;  %1457 = vst [vmem:[%s2458_s22 + $0xd0] sm:$0xff] %v1393_v1  ;;  %v1269_v19 = vadd.f32 1.0, %v2024_v51 }
 0x1bb   : > { %v2028_v44 = vpop.eup %2027  ;;  %1489 = vst [vmem:[%s2458_s22 + $0x1d0] sm:$0xff] %v1425_v45  ;;  %v1301_v11 = vadd.f32 1.0, %v2026_v2 }
 0x1bc   : > { %v2030_v47 = vpop.eup %2029  ;;  %v1394_v24 = vmul.f32 %v2028_v44, %v1010_v3  ;;  %2043 = vrcp.f32 %v1269_v19 }
 0x1bd   : > { %v2032_v14 = vpop.eup %2031  ;;  %v1426_v17 = vmul.f32 %v2030_v47, %v1042_v10  ;;  %2045 = vrcp.f32 %v1301_v11 }
 0x1be   : > { %v2034_v12 = vpop.eup %2033  ;;  %1458 = vst [vmem:[%s2458_s22 + $0xd8] sm:$0xff] %v1394_v24  ;;  %v1270_v5 = vadd.f32 1.0, %v2032_v14 }
 0x1bf   : > { %1490 = vst [vmem:[%s2458_s22 + $0x1d8] sm:$0xff] %v1426_v17  ;;  %v1302_v18 = vadd.f32 1.0, %v2034_v12 }
 0x1c0   : > { %2047 = vrcp.f32 %v1270_v5 }
 0x1c1   : > { %v2036_v37 = vpop.eup %2035  ;;  %2049 = vrcp.f32 %v1302_v18 }
 0x1c2   : > { %v2038_v26 = vpop.eup %2037  ;;  %v1395_v22 = vmul.f32 %v2036_v37, %v1011_v50 }
 0x1c3   : > { %v1427_v60 = vmul.f32 %v2038_v26, %v1043_v9 }
 0x1c4   : > { %1459 = vst [vmem:[%s2458_s22 + $0xe0] sm:$0xff] %v1395_v22 }
 0x1c5   : > { %v2040_v28 = vpop.eup %2039  ;;  %1491 = vst [vmem:[%s2458_s22 + $0x1e0] sm:$0xff] %v1427_v60 }
 0x1c6   : > { %v2042_v4 = vpop.eup %2041  ;;  %v1396_v49 = vmul.f32 %v2040_v28, %v1012_v7 }
 0x1c7   : > { %v1428_v31 = vmul.f32 %v2042_v4, %v1044_v25 }
 0x1c8   : > { %1460 = vst [vmem:[%s2458_s22 + $0xe8] sm:$0xff] %v1396_v49 }
 0x1c9   : > { %v2044_v56 = vpop.eup %2043  ;;  %1492 = vst [vmem:[%s2458_s22 + $0x1e8] sm:$0xff] %v1428_v31 }
 0x1ca   : > { %v2046_v38 = vpop.eup %2045  ;;  %v1397_v30 = vmul.f32 %v2044_v56, %v1013_v32 }
 0x1cb   : > { %v1429_v23 = vmul.f32 %v2046_v38, %v1045_v55 }
 0x1cc   : > { %1461 = vst [vmem:[%s2458_s22 + $0xf0] sm:$0xff] %v1397_v30 }
 0x1cd   : > { %v2048_v40 = vpop.eup %2047  ;;  %1493 = vst [vmem:[%s2458_s22 + $0x1f0] sm:$0xff] %v1429_v23 }
 0x1ce   : > { %v2050_v27 = vpop.eup %2049  ;;  %v1398_v20 = vmul.f32 %v2048_v40, %v1014_v39 }
 0x1cf   : > { %v1430_v48 = vmul.f32 %v2050_v27, %v1046_v52 }
 0x1d0   : > { %1462 = vst [vmem:[%s2458_s22 + $0xf8] sm:$0xff] %v1398_v20 }
 0x1d1   : > { %1494 = vst [vmem:[%s2458_s22 + $0x1f8] sm:$0xff] %v1430_v48 }
 0x1d2   : > { %2119 = shalt.err (!%p2116_p0)
}
 0x1d3   : > { %s2120_s28 = scalar_lea.hbm %s2744_s9, 8192  ;;  %s2124_s20 = scalar_lea.hbm %s2794_s3, 16384 }
 0x1d4   : > { %p2121_p5 = scmp.ne.s32.totalorder %s2744_s9, %s2120_s28  ;;  %p2125_p4 = scmp.lt.s32.totalorder %s2744_s9, %s2794_s3 }
 0x1d5   : > { %p2126_p6 = scmp.lt.s32.totalorder %s2124_s20, %s2120_s28 }
 0x1d6   : > { %p2122_p9 = pnand %p2121_p5, %p2810_p11 }
 0x1d7   : > { %p2127_p8 = por %p2126_p6, %p2125_p4 }
 0x1d8   : > { %p2123_p1 = pneg %p2122_p9 }
 0x1da   : > { %p2128_p3 = pnand %p2127_p8, %p2123_p1 }
 0x1dc   : > { %2131 = shalt.err (!%p2128_p3)
}
 0x1dd   : > { %s2184_s23 = smov 128   ;;  %s2185_s25 = smov 8  }
 0x1de   : > { %1681 = dma.vmem_to_hbm [thread:$0]  (%p2810_p11), %s2746_s4, 8192, %s2744_s9, %s1496_s16, %s2184_s23, %s2184_s23, %s2185_s25  }
 0x1df PF: > { %s1524_s30 = sand.u32 1, %s2162_s12   ;;  %p2811_p7 = scmp.ne.s32.totalorder %s2800_s19, 0 }
 0x1e0   : > { %p2812_p12 = scmp.ge.s32.totalorder %s2174_s15, 2  ;;  %s1525_s7 = scalar_lea.sflag [#allocation4], %s1524_s30 }
 0x1e2   : > { %p1692_p10 = pnand %p2812_p12, %p2811_p7 }
 0x1e4   : > { %p1693_p2 = pneg %p1692_p10 }
 0x1e6   : > { %2157 = dma.done.wait (%p1693_p2), %s1525_s7, 8192  }
 0x1e7   : > { %2159 = vsyncadd (%p1693_p2), %s1525_s7, 4294959104  ;;  %p17_p13 = scmp.ge.s32.totalorder %s2260_s24, 4   ;;  %s2813_s12 = smov %s2166_s13 }
 0x1e8   : > { %s2814_s13 = smov %s2170_s14  ;;  %s2815_s14 = smov %s2277_s5 }
 0x1e9   : > { %s2816_s15 = smov %s2260_s24  ;;  %19 = sbr.rel (!%p17_p13) target bundleno = 6 (0x6), region = 81 }
 0x1ee   :  { %1530 = vsyncpa [#allocation3], 1 }
 0x1ef   :  { %1532 = vsyncpa [#allocation3 + $0x1], 1 }
 0x1f0   :  { %1533 = vsyncpa [#allocation6], 1 }
 0x1f1   :  { %1534 = vsyncpa [#allocation4], 1 }
 0x1f2   :  { %1536 = vsyncpa [#allocation4 + $0x1], 1 }

</bundles_post_ra>
